<compile_context>
chip_gen: v5e
topology: v5e:2x2
jax: 0.10.0
libtpu: 0.0.40
codegen_flags: <defaults>
</compile_context>

<pallas_src>
import functools

import jax
import jax.numpy as jnp
from jax import lax
from jax.experimental import pallas as pl
from jax.experimental.pallas import tpu as pltpu


def _round_up(a, b):
    return (a + b - 1) // b * b


# --------------------------------------------------------------------------- #
# Kernel A: per-edge messages, computed once per E tile.
# --------------------------------------------------------------------------- #
def edge_msg_kernel(supportT_ref,   # VMEM [Fout, N_pad]        bf16 (resident)
                    esrc_ref,       # VMEM [1, tE]              int32
                    eddT_ref,       # VMEM [Fout_i, Fout_j, tE] bf16
                    msgT_ref,       # VMEM [Fout_i, tE]         bf16 (out)
                    *, fj_chunk, mul_dtype):
    fout, n_pad = supportT_ref.shape
    t_e = esrc_ref.shape[1]

    # Gather edge_support with a one-hot matmul on the MXU:
    #   onehot[n, e] = (n == esrc[e]);  esupT = support^T @ onehot -> [Fout_j, tE]
    # TODO(synk): for very large N_pad, switch to a blocked dynamic-slice gather so
    # support^T does not need to be fully VMEM-resident.
    node_ids = lax.broadcasted_iota(jnp.int32, (n_pad, t_e), 0)
    onehot = (node_ids == esrc_ref[...]).astype(jnp.bfloat16)          # [N_pad, tE]
    esupT = jnp.dot(supportT_ref[...], onehot,
                    preferred_element_type=jnp.float32)                # [Fout_j, tE]
    esupT = esupT.astype(mul_dtype)

    # Per-edge mat-vec: msgT[i, e] = sum_j eddT[i, j, e] * esupT[j, e].
    # Edge axis lane-dense; reduction over sublanes (Fout_j), chunked so the
    # promoted temporary never spans the full Fout_j extent.
    msg = jnp.zeros((fout, t_e), jnp.float32)
    for c in range(0, fout, fj_chunk):
        hi = min(c + fj_chunk, fout)
        blk = eddT_ref[:, c:hi, :]
        if blk.dtype != mul_dtype:
            blk = blk.astype(mul_dtype)
        prod = blk * esupT[None, c:hi, :]                              # [Fi, sz, tE]
        msg = msg + jnp.sum(prod, axis=1, dtype=jnp.float32)
    msgT_ref[...] = msg.astype(msgT_ref.dtype)


# --------------------------------------------------------------------------- #
# Kernel B: out^T = Etgt-scatter of edge messages (+ bias), resident accumulator.
# --------------------------------------------------------------------------- #
def scatter_kernel(etgt_ref,   # VMEM [1, tE]      int32
                   msgT_ref,   # VMEM [Fout, tE]   bf16
                   bias_ref,   # VMEM [Fout, 1]    f32
                   outT_ref):  # VMEM [Fout, tN]   f32 (resident across E tiles)
    i = pl.program_id(0)
    j = pl.program_id(1)
    t_n = outT_ref.shape[1]
    t_e = etgt_ref.shape[1]

    @pl.when(j == 0)
    def _():
        outT_ref[...] = jnp.broadcast_to(bias_ref[...], outT_ref.shape)

    # On-the-fly 0/1 Etgt tile: onehot[n, e] = (i*tN + n == etgt_idx[e]).
    row_ids = lax.broadcasted_iota(jnp.int32, (t_n, t_e), 0) + i * t_n
    onehot = (row_ids == etgt_ref[...]).astype(jnp.bfloat16)           # [tN, tE]

    # out^T[f, n] += sum_e msgT[f, e] * onehot[n, e]  (contract the lane axes).
    outT_ref[...] += lax.dot_general(
        msgT_ref[...], onehot,
        dimension_numbers=(((1,), (1,)), ((), ())),
        preferred_element_type=jnp.float32)


# --------------------------------------------------------------------------- #
# Wrapper
# --------------------------------------------------------------------------- #
def edge_graph_convolution(x, weight, bias, esrc, etgt_idx, edge_data):
    """Forward pass. Etgt is represented sparsely: etgt_idx[e] = target node of edge e."""
    N, _ = x.shape
    Fout = weight.shape[1]
    E = esrc.shape[0]
    if bias is None:
        bias = jnp.zeros((Fout,), jnp.float32)

    kind = jax.devices()[0].device_kind.lower()
    small_vmem = ("v7" in kind) or ("7x" in kind)      # v7x: 64 MiB VMEM / TensorCore
    f32_vpu = ("v4" in kind) or ("v5" in kind)         # no bf16 VALU on v4/v5
    mul_dtype = jnp.float32 if f32_vpu else jnp.bfloat16

    # ---- tiling --------------------------------------------------------------
    tN = 128 if (N <= 128 or small_vmem) else 256      # lane-dense output tile
    N_pad = _round_up(N, tN)
    fj_chunk = min(_round_up(Fout, 8), 32)

    # tE from an explicit VMEM working-set budget (double buffers + temporaries).
    budget = (20 << 20) if small_vmem else (64 << 20)
    vmem_limit = (40 << 20) if small_vmem else (100 << 20)
    avail = max(budget - 2 * Fout * N_pad * 2, 4 << 20)     # support^T is resident
    bytes_per_e = (2 * Fout * Fout * 2      # edge_data tile, double-buffered bf16
                   + 2 * Fout * 2           # msgT tile (A out / B in), double-buffered
                   + N_pad * 2 + tN * 2     # one-hot temporaries (src / tgt)
                   + Fout * fj_chunk * 4    # chunked contraction temp (f32 bound)
                   + 3 * Fout * 4           # esupT + f32 msg accumulator + slack
                   + 16)                    # int32 index tiles
    tE = max(128, min(4096, (avail // bytes_per_e) // 128 * 128))
    tE = min(tE, _round_up(E, 128))
    E_pad = _round_up(E, tE)
    nE = E_pad // tE
    nI = N_pad // tN

    # ---- stage operands (one-time XLA work; bf16 HBM streams, f32 accumulation)
    support = jnp.dot(x.astype(jnp.float32), weight.astype(jnp.float32))  # [N, Fout]
    supportT = jnp.zeros((Fout, N_pad), jnp.bfloat16).at[:, :N].set(
        support.T.astype(jnp.bfloat16))
    esrc_p = jnp.zeros((1, E_pad), jnp.int32).at[0, :E].set(esrc.astype(jnp.int32))
    # Padded edges target the (non-existent) node N_pad -> they contribute nothing.
    etgt_p = jnp.full((1, E_pad), N_pad, jnp.int32).at[0, :E].set(
        etgt_idx.astype(jnp.int32))
    # Pre-transpose edge_data to [Fout_i, Fout_j, E]: edge axis lane-dense.
    eddT = jnp.zeros((Fout, Fout, E_pad), jnp.bfloat16).at[:, :, :E].set(
        jnp.transpose(edge_data, (1, 2, 0)).astype(jnp.bfloat16))
    bias2d = bias.reshape(Fout, 1).astype(jnp.float32)

    # ---- kernel A: edge_msg^T [Fout, E_pad], computed exactly once ------------
    cost_a = pl.CostEstimate(
        flops=int(2 * Fout * N_pad * E_pad + 2 * Fout * Fout * E_pad),
        transcendentals=0,
        bytes_accessed=int(Fout * N_pad * 2 + Fout * Fout * E_pad * 2
                           + E_pad * 4 + Fout * E_pad * 2))
    msgT = pl.pallas_call(
        functools.partial(edge_msg_kernel, fj_chunk=fj_chunk, mul_dtype=mul_dtype),
        out_shape=jax.ShapeDtypeStruct((Fout, E_pad), jnp.bfloat16),
        grid_spec=pltpu.PrefetchScalarGridSpec(
            num_scalar_prefetch=0,
            grid=(nE,),
            in_specs=[
                pl.BlockSpec((Fout, N_pad), lambda j: (0, 0)),        # support^T (resident)
                pl.BlockSpec((1, tE), lambda j: (0, j)),              # esrc tile
                pl.BlockSpec((Fout, Fout, tE), lambda j: (0, 0, j)),  # edge_data^T tile
            ],
            out_specs=pl.BlockSpec((Fout, tE), lambda j: (0, j)),
        ),
        compiler_params=pltpu.CompilerParams(
            dimension_semantics=("parallel",),
            vmem_limit_bytes=vmem_limit),
        cost_estimate=cost_a,
    )(supportT, esrc_p, eddT)

    # ---- kernel B: out^T[Fout, N_pad] = Etgt @ edge_msg + bias ---------------
    cost_b = pl.CostEstimate(
        flops=int(2 * Fout * E_pad * N_pad),
        transcendentals=0,
        bytes_accessed=int(nI * (Fout * E_pad * 2 + E_pad * 4)   # msgT/etgt re-streamed per N tile
                           + Fout * N_pad * 4 + Fout * 4))
    outT = pl.pallas_call(
        scatter_kernel,
        out_shape=jax.ShapeDtypeStruct((Fout, N_pad), jnp.float32),
        grid_spec=pltpu.PrefetchScalarGridSpec(
            num_scalar_prefetch=0,
            grid=(nI, nE),
            in_specs=[
                pl.BlockSpec((1, tE), lambda i, j: (0, j)),        # etgt tile
                pl.BlockSpec((Fout, tE), lambda i, j: (0, j)),     # edge_msg^T tile
                pl.BlockSpec((Fout, 1), lambda i, j: (0, 0)),      # bias
            ],
            out_specs=pl.BlockSpec((Fout, tN), lambda i, j: (0, i)),
        ),
        compiler_params=pltpu.CompilerParams(
            dimension_semantics=("parallel", "arbitrary"),
            vmem_limit_bytes=vmem_limit),
        cost_estimate=cost_b,
    )(etgt_p, msgT, bias2d)

    return outT.T[:N]


def reference_forward(x, weight, bias, esrc, etgt_idx, edge_data):
    N = x.shape[0]
    E = esrc.shape[0]
    support = x @ weight
    edge_support = support[esrc]
    edge_msg = jnp.einsum('eij,ej->ei', edge_data, edge_support)
    etgt_dense = jnp.zeros((N, E), x.dtype).at[etgt_idx, jnp.arange(E)].set(1.0)
    out = etgt_dense @ edge_msg
    if bias is not None:
        out = out + bias[None, :]
    return out


if __name__ == "__main__":
    key = jax.random.PRNGKey(0)
    k_x, k_w, k_b, k_src, k_tgt, k_ed = jax.random.split(key, 6)

    N, E = 16, 24                       # nodes, edges
    in_features, out_features = 32, 32

    # Deterministic synthetic parameters (mirrors reset_parameters: U(-stdv, stdv))
    stdv = 1.0 / (out_features ** 0.5)
    weight = jax.random.uniform(k_w, (in_features, out_features),
                                minval=-stdv, maxval=stdv, dtype=jnp.float32)
    bias = jax.random.uniform(k_b, (out_features,),
                              minval=-stdv, maxval=stdv, dtype=jnp.float32)

    # Inputs
    x = jax.random.normal(k_x, (N, in_features), dtype=jnp.float32)
    esrc = jax.random.randint(k_src, (E,), 0, N, dtype=jnp.int32)
    etgt_idx = jax.random.randint(k_tgt, (E,), 0, N, dtype=jnp.int32)
    edge_data = jax.random.normal(k_ed, (E, out_features, out_features),
                                  dtype=jnp.float32)

    out = edge_graph_convolution(x, weight, bias, esrc, etgt_idx, edge_data)
    out = jax.block_until_ready(out)

    ref = reference_forward(x, weight, bias, esrc, etgt_idx, edge_data)
    assert out.shape == (N, out_features)
    # bf16 HBM streams with f32 accumulation: scale-relative tolerance vs f32 ref.
    err = float(jnp.max(jnp.abs(out - ref)))
    scale = float(jnp.max(jnp.abs(ref)))
    assert err <= 0.03 * scale + 1e-2, f"mismatch vs reference: err={err}, scale={scale}"

    print("KERNEL_OK")
</pallas_src>

<mosaic_0001>
module attributes {stable_mosaic.version = 11 : i64} {
  func.func @edge_msg_kernel(%arg0: i32, %arg1: memref<32x128xbf16, #tpu.memory_space<vmem>>, %arg2: memref<1x128xi32, #tpu.memory_space<vmem>>, %arg3: memref<32x32x128xbf16, #tpu.memory_space<vmem>>, %arg4: memref<32x128xbf16, #tpu.memory_space<vmem>>) attributes {dimension_semantics = [#tpu.dimension_semantics<parallel>], iteration_bounds = array<i64: 1>, scalar_prefetch = 0 : i64, scratch_operands = 0 : i64, tpu.core_type = #tpu.core_type<tc>, window_params = [{pipeline_mode = #tpu.pipeline_mode<synchronous>, transform_indices = @transform_0, window_bounds = array<i64: 32, 128>}, {transform_indices = @transform_1, window_bounds = array<i64: 1, 128>}, {transform_indices = @transform_2, window_bounds = array<i64: 32, 32, 128>}, {transform_indices = @transform_3, window_bounds = array<i64: 32, 128>}]} {
    %0 = tpu.iota {dimensions = array<i32: 0>} : vector<128x128xi32>
    %c0 = arith.constant 0 : index
    %c0_0 = arith.constant 0 : index
    %1 = vector.load %arg2[%c0, %c0_0] : memref<1x128xi32, #tpu.memory_space<vmem>>, vector<1x128xi32>
    %2 = vector.broadcast %1 : vector<1x128xi32> to vector<128x128xi32>
    %3 = arith.cmpi eq, %0, %2 : vector<128x128xi32>
    %4 = arith.extui %3 : vector<128x128xi1> to vector<128x128xi32>
    %5 = arith.sitofp %4 : vector<128x128xi32> to vector<128x128xf32>
    %6 = arith.truncf %5 : vector<128x128xf32> to vector<128x128xbf16>
    %c0_1 = arith.constant 0 : index
    %c0_2 = arith.constant 0 : index
    %7 = vector.load %arg1[%c0_1, %c0_2] : memref<32x128xbf16, #tpu.memory_space<vmem>>, vector<32x128xbf16>
    %cst = arith.constant dense<0.000000e+00> : vector<32x128xf32>
    %8 = tpu.matmul %7, %6, %cst {dimension_numbers = #tpu.dot_dimension_numbers<[1], [0], [0], [1], [0, 0, 1, 1], [], []>} : vector<32x128xbf16>, vector<128x128xbf16>, vector<32x128xf32> -> vector<32x128xf32>
    %9 = arith.truncf %8 : vector<32x128xf32> to vector<32x128xbf16>
    %cst_3 = arith.constant 0.000000e+00 : f32
    %10 = vector.broadcast %cst_3 : f32 to vector<32x128xf32>
    %c0_4 = arith.constant 0 : index
    %c0_5 = arith.constant 0 : index
    %c0_6 = arith.constant 0 : index
    %11 = vector.load %arg3[%c0_4, %c0_5, %c0_6] : memref<32x32x128xbf16, #tpu.memory_space<vmem>>, vector<32x32x128xbf16>
    %12 = vector.shape_cast %9 : vector<32x128xbf16> to vector<1x32x128xbf16>
    %13 = vector.broadcast %12 : vector<1x32x128xbf16> to vector<32x32x128xbf16>
    %14 = arith.mulf %11, %13 : vector<32x32x128xbf16>
    %15 = arith.extf %14 : vector<32x32x128xbf16> to vector<32x32x128xf32>
    %cst_7 = arith.constant dense<0.000000e+00> : vector<32x128xf32>
    %16 = vector.multi_reduction <add>, %15, %cst_7 [1] : vector<32x32x128xf32> to vector<32x128xf32>
    %17 = arith.addf %10, %16 : vector<32x128xf32>
    %18 = arith.truncf %17 : vector<32x128xf32> to vector<32x128xbf16>
    %c0_8 = arith.constant 0 : index
    %c0_9 = arith.constant 0 : index
    %19 = vector.load %arg4[%c0_8, %c0_9] : memref<32x128xbf16, #tpu.memory_space<vmem>>, vector<32x128xbf16>
    tpu.vector_store %arg4[%c0_8, %c0_9], %18 {strides = array<i32>} : memref<32x128xbf16, #tpu.memory_space<vmem>>, vector<32x128xbf16>,
    return
  }
  func.func @transform_0(%arg0: i32) -> (i32, i32) {
    %c0_i32 = arith.constant 0 : i32
    %c0_i32_0 = arith.constant 0 : i32
    %c0_i32_1 = arith.constant 0 : i32
    return %c0_i32, %c0_i32_0 : i32, i32
  }
  func.func @transform_1(%arg0: i32) -> (i32, i32) {
    %c0_i32 = arith.constant 0 : i32
    %c0_i32_0 = arith.constant 0 : i32
    return %c0_i32, %arg0 : i32, i32
  }
  func.func @transform_2(%arg0: i32) -> (i32, i32, i32) {
    %c0_i32 = arith.constant 0 : i32
    %c0_i32_0 = arith.constant 0 : i32
    %c0_i32_1 = arith.constant 0 : i32
    return %c0_i32, %c0_i32_0, %arg0 : i32, i32, i32
  }
  func.func @transform_3(%arg0: i32) -> (i32, i32) {
    %c0_i32 = arith.constant 0 : i32
    %c0_i32_0 = arith.constant 0 : i32
    return %c0_i32, %arg0 : i32, i32
  }
}

</mosaic_0001>

<bundles_post_ra>
// kernel: tpu_custom_call.1
= control target key start
LH: loop header
LB: loop body
LE: loop exit
PB: predicated region body
PF: predicated region fallthrough
CT: control target
= control target key end

     0   :  { %8 = vsyncpa [#allocation3], 0  ;;  %s3456_s0 = inlined_call_operand.hbm [shape: bf16[32,128], index: 0, kind: input, shape index: {}]   ;;  %s3457_s1 = inlined_call_operand.hbm [shape: s32[1,128], index: 1, kind: input, shape index: {}]   ;;  %s3458_s2 = inlined_call_operand.hbm [shape: bf16[32,32,128], index: 2, kind: input, shape index: {}]   ;;  %s3459_s3 = inlined_call_operand.hbm [shape: bf16[32,128], index: 3, kind: output, shape index: {}]  }
   0x1   :  { %9 = vsyncpa [#allocation6], 0  ;;  %s29_s14 = sshll.u32 %s3457_s1, 4  ;;  %s30_s14 = int_to_ptr.hbm [resolvable:$true] %s29_s14 }
   0x2   :  { %10 = vsyncpa [#allocation4], 0  ;;  %s1716_s15 = smov [#allocation5]   ;;  %s15_s19 = sshll.u32 %s3456_s0, 4  ;;  %s16_s19 = int_to_ptr.hbm [resolvable:$true] %s15_s19 }
   0x3   :  { %s31_s16 = sshll.u32 %s1716_s15, 4  ;;  %s1717_s20 = smov [#allocation2]   ;;  %s32_s16 = int_to_ptr.vmem [resolvable:$true] %s31_s16 }
   0x4   :  { %34 = dma.hbm_to_vmem [thread:$0]  %s30_s14, 16, %s32_s16, [#allocation6]  }
   0x5   :  { %s17_s21 = sshll.u32 %s1717_s20, 4  ;;  %s1718_s22 = smov 64   ;;  %s18_s21 = int_to_ptr.vmem [resolvable:$true] %s17_s21 }
   0x6   :  { %s1719_s23 = smov 4   ;;  %s39_s25 = sshll.u32 %s3458_s2, 4  ;;  %s40_s25 = int_to_ptr.hbm [resolvable:$true] %s39_s25 }
   0x7   :  { %23 = dma.hbm_to_vmem [thread:$0]  %s16_s19, 256, %s18_s21, [#allocation3], %s1718_s22, %s1718_s22, %s1719_s23  }
   0x8   :  { %s1720_s26 = smov [#allocation7]  }
   0x9   :  { %s41_s27 = sshll.u32 %s1720_s26, 4  ;;  %s42_s27 = int_to_ptr.vmem [resolvable:$true] %s41_s27 }
   0xa   :  { %47 = dma.hbm_to_vmem [thread:$0]  %s40_s25, 8192, %s42_s27, [#allocation6], %s1718_s22, %s1718_s22, %s1719_s23  }
   0xb   :  { %1710 = dma.done.wait [#allocation3], 256  }
   0xc   :  { %1711 = vsyncadd [#allocation3], 4294967040 }
   0xd   :  { %1712 = dma.done.wait [#allocation6], 8208  }
   0xe   :  { %1713 = vsyncadd [#allocation6], 4294959088  ;;  %v60_v0 = vlaneseq  ;;  %v1613_v6 = vld [vmem:[#allocation5] ss:$0 sm:$0xff]  ;;  %v1721_v9 = vmov 1.0|1.0  }
   0xf   :  { %v1277_v19 = vld [vmem:[#allocation2] sm:$0xff]  ;;  %v1278_v20 = vld [vmem:[#allocation2 + $0x8] sm:$0xff]  ;;  %v1758_v21 = vld [vmem:[#allocation7] sm:$0xff]   ;;  %s1722_s0 = smov [#allocation8]   ;;  %s1223_s30 = sshll.u32 %s3459_s3, 4  ;;  %s1224_s30 = int_to_ptr.hbm [resolvable:$true] %s1223_s30 }
  0x10   :  { %v61_v1 = vshrl.u32 %v60_v0, 7  ;;  %v1760_v22 = vld [vmem:[#allocation7 + $0x10] sm:$0xff]   ;;  %v1762_v23 = vld [vmem:[#allocation7 + $0x20] sm:$0xff]   ;;  %v1770_v27 = vld [vmem:[#allocation7 + $0x8] sm:$0xff]   ;;  %s1221_s2 = sshll.u32 %s1722_s0, 4  ;;  %s1222_s2 = int_to_ptr.vmem [resolvable:$true] %s1221_s2 }
  0x11   :  { %v1764_v24 = vld [vmem:[#allocation7 + $0x30] sm:$0xff]   ;;  %v1766_v25 = vld [vmem:[#allocation7 + $0x40] sm:$0xff]   ;;  %v1772_v28 = vld [vmem:[#allocation7 + $0x18] sm:$0xff]   ;;  %v3548_v30 = vunpack.c.l.bf16 %v1770_v27  ;;  %v3550_v33 = vunpack.c.l.bf16 %v1760_v22 }
  0x12   :  { %v75_v2 = vadd.s32 112, %v61_v1  ;;  %v76_v3 = vadd.s32 120, %v61_v1  ;;  %v73_v4 = vadd.s32 96, %v61_v1  ;;  %v74_v5 = vadd.s32 104, %v61_v1  ;;  %v1768_v26 = vld [vmem:[#allocation7 + $0x50] sm:$0xff]   ;;  %v1774_v29 = vld [vmem:[#allocation7 + $0x28] sm:$0xff]  }
  0x13   :  { %v71_v7 = vadd.s32 80, %v61_v1  ;;  %v72_v8 = vadd.s32 88, %v61_v1  ;;  %v69_v10 = vadd.s32 64, %v61_v1  ;;  %v70_v11 = vadd.s32 72, %v61_v1  ;;  %v1780_v34 = vld [vmem:[#allocation7 + $0x38] sm:$0xff]   ;;  %v1782_v35 = vld [vmem:[#allocation7 + $0x48] sm:$0xff]  }
  0x14   :  { %vm93_vm0 = vcmp.eq.s32.totalorder %v75_v2, %v1613_v6  ;;  %vm94_vm1 = vcmp.eq.s32.totalorder %v76_v3, %v1613_v6  ;;  %vm91_vm2 = vcmp.eq.s32.totalorder %v73_v4, %v1613_v6  ;;  %vm92_vm3 = vcmp.eq.s32.totalorder %v74_v5, %v1613_v6  ;;  %v1784_v36 = vld [vmem:[#allocation7 + $0x58] sm:$0xff]   ;;  %v1790_v41 = vld [vmem:[#allocation7 + $0x60] sm:$0xff]   ;;  %v1792_v42 = vld [vmem:[#allocation7 + $0x68] sm:$0xff]  }
  0x15   :  { %vm1261_vm4 = vmpackc.low %vm94_vm1, %vm93_vm0  ;;  %vm89_vm6 = vcmp.eq.s32.totalorder %v71_v7, %v1613_v6  ;;  %vm90_vm7 = vcmp.eq.s32.totalorder %v72_v8, %v1613_v6  ;;  %vm87_vm9 = vcmp.eq.s32.totalorder %v69_v10, %v1613_v6  ;;  %vm88_vm10 = vcmp.eq.s32.totalorder %v70_v11, %v1613_v6  ;;  %v1794_v43 = vld [vmem:[#allocation7 + $0x70] sm:$0xff]   ;;  %v1800_v48 = vld [vmem:[#allocation7 + $0x78] sm:$0xff]  }
  0x16   :  { %1262 = vmatpush.bf16.msk.msra.mxu0 %vm1261_vm4, %v1721_v9  ;;  %1598 = vmatpush.bf16.msk.msra.mxu1 %vm1261_vm4, %v1721_v9  ;;  %vm1263_vm5 = vmpackc.low %vm92_vm3, %vm91_vm2  ;;  %v67_v12 = vadd.s32 48, %v61_v1  ;;  %v68_v13 = vadd.s32 56, %v61_v1  ;;  %v65_v14 = vadd.s32 32, %v61_v1  ;;  %v66_v15 = vadd.s32 40, %v61_v1  ;;  %v1802_v49 = vld [vmem:[#allocation7 + $0x80] sm:$0xff]   ;;  %v1804_v50 = vld [vmem:[#allocation7 + $0x88] sm:$0xff]  }
  0x17   :  { %vm1265_vm8 = vmpackc.low %vm90_vm7, %vm89_vm6  ;;  %v63_v16 = vadd.s32 16, %v61_v1  ;;  %v64_v17 = vadd.s32 24, %v61_v1  ;;  %v62_v18 = vadd.s32 8, %v61_v1  ;;  %v1810_v55 = vld [vmem:[#allocation7 + $0x90] sm:$0xff]   ;;  %v1812_v56 = vld [vmem:[#allocation7 + $0x98] sm:$0xff]  }
  0x18   :  { %vm1267_vm11 = vmpackc.low %vm88_vm10, %vm87_vm9  ;;  %vm85_vm12 = vcmp.eq.s32.totalorder %v67_v12, %v1613_v6  ;;  %vm86_vm13 = vcmp.eq.s32.totalorder %v68_v13, %v1613_v6  ;;  %vm83_vm15 = vcmp.eq.s32.totalorder %v65_v14, %v1613_v6  ;;  %vm84_vm0 = vcmp.eq.s32.totalorder %v66_v15, %v1613_v6  ;;  %v1814_v57 = vld [vmem:[#allocation7 + $0xa0] sm:$0xff]   ;;  %v1820_v62 = vld [vmem:[#allocation7 + $0xa8] sm:$0xff]  }
  0x19   :  { %vm1269_vm14 = vmpackc.low %vm86_vm13, %vm85_vm12  ;;  %vm81_vm2 = vcmp.eq.s32.totalorder %v63_v16, %v1613_v6  ;;  %vm82_vm3 = vcmp.eq.s32.totalorder %v64_v17, %v1613_v6  ;;  %vm80_vm6 = vcmp.eq.s32.totalorder %v62_v18, %v1613_v6  ;;  %v1822_v63 = vld [vmem:[#allocation7 + $0xb0] sm:$0xff]   ;;  %v1824_v0 = vld [vmem:[#allocation7 + $0xb8] sm:$0xff]   ;;  %vm1172_vm9 = vcmask 1042434  }
  0x1a   :  { %1264 = vmatpush.bf16.msk.msra.mxu0 %vm1263_vm5, %v1721_v9  ;;  %1599 = vmatpush.bf16.msk.msra.mxu1 %vm1263_vm5, %v1721_v9  ;;  %vm1271_vm1 = vmpackc.low %vm84_vm0, %vm83_vm15  ;;  %vm79_vm5 = vcmp.eq.s32.totalorder %v61_v1, %v1613_v6  ;;  %v1846_v10 = vld [vmem:[#allocation7 + $0xc0] sm:$0xff]   ;;  %v1848_v11 = vld [vmem:[#allocation7 + $0xc8] sm:$0xff]   ;;  %vm1174_vm10 = vcmask 1043459   ;;  %vm1178_vm12 = vcmask 1045509   ;;  %vm1180_vm13 = vcmask 1046534  }
  0x1b   :  { %vm1273_vm4 = vmpackc.low %vm82_vm3, %vm81_vm2  ;;  %v1854_v12 = vld [vmem:[#allocation7 + $0xd0] sm:$0xff]   ;;  %v1856_v17 = vld [vmem:[#allocation7 + $0xd8] sm:$0xff]  }
  0x1c   :  { %vm1275_vm7 = vmpackc.low %vm80_vm6, %vm79_vm5  ;;  %v1862_v8 = vld [vmem:[#allocation7 + $0xe0] sm:$0xff]   ;;  %v1864_v13 = vld [vmem:[#allocation7 + $0xe8] sm:$0xff]  }
  0x1d   :  { %v1870_v6 = vld [vmem:[#allocation7 + $0xf0] sm:$0xff]   ;;  %v1878_v4 = vld [vmem:[#allocation7 + $0x100] sm:$0xff]   ;;  %v1880_v15 = vld [vmem:[#allocation7 + $0x108] sm:$0xff]  }
  0x1e   :  { %1266 = vmatpush.bf16.msk.msra.mxu0 %vm1265_vm8, %v1721_v9  ;;  %1600 = vmatpush.bf16.msk.msra.mxu1 %vm1265_vm8, %v1721_v9  ;;  %v1886_v2 = vld [vmem:[#allocation7 + $0x110] sm:$0xff]   ;;  %v1888_v18 = vld [vmem:[#allocation7 + $0x118] sm:$0xff]   ;;  %v1894_v61 = vld [vmem:[#allocation7 + $0x120] sm:$0xff]   ;;  %vm1170_vm8 = vcmask 1041409  }
  0x1f   :  { %v1896_v14 = vld [vmem:[#allocation7 + $0x128] sm:$0xff]   ;;  %v1902_v59 = vld [vmem:[#allocation7 + $0x130] sm:$0xff]   ;;  %v1910_v54 = vld [vmem:[#allocation7 + $0x140] sm:$0xff]  }
  0x20   :  { %v1912_v16 = vld [vmem:[#allocation7 + $0x148] sm:$0xff]   ;;  %v1918_v52 = vld [vmem:[#allocation7 + $0x150] sm:$0xff]   ;;  %v1926_v47 = vld [vmem:[#allocation7 + $0x160] sm:$0xff]  }
  0x21   :  { %v1928_v7 = vld [vmem:[#allocation7 + $0x168] sm:$0xff]   ;;  %v1934_v46 = vld [vmem:[#allocation7 + $0x170] sm:$0xff]   ;;  %v1936_v5 = vld [vmem:[#allocation7 + $0x178] sm:$0xff]  }
  0x22   :  { %1268 = vmatpush.bf16.msk.msra.mxu0 %vm1267_vm11, %v1721_v9  ;;  %1601 = vmatpush.bf16.msk.msra.mxu1 %vm1267_vm11, %v1721_v9  ;;  %3532 = vst [vmem:[#allocation12_spill] sm:$0xff] %v1934_v46  ;;  %v1942_v45 = vld [vmem:[#allocation7 + $0x180] sm:$0xff]   ;;  %v1944_v3 = vld [vmem:[#allocation7 + $0x188] sm:$0xff]   ;;  %v1950_v44 = vld [vmem:[#allocation7 + $0x190] sm:$0xff]   ;;  %vm1176_vm11 = vcmask 1044484  }
  0x23   :  { %3533 = vst [vmem:[#allocation13_spill] sm:$0xff] %v1936_v5  ;;  %v1952_v1 = vld [vmem:[#allocation7 + $0x198] sm:$0xff]   ;;  %v1958_v38 = vld [vmem:[#allocation7 + $0x1a0] sm:$0xff]   ;;  %v1960_v60 = vld [vmem:[#allocation7 + $0x1a8] sm:$0xff]  }
  0x24   :  { %3534 = vst [vmem:[#allocation14_spill] sm:$0xff] %v1942_v45  ;;  %v1966_v37 = vld [vmem:[#allocation7 + $0x1b0] sm:$0xff]   ;;  %v1968_v58 = vld [vmem:[#allocation7 + $0x1b8] sm:$0xff]   ;;  %v1974_v5 = vld [vmem:[#allocation7 + $0x1c0] sm:$0xff]  }
  0x25   :  { %3535 = vst [vmem:[#allocation15_spill] sm:$0xff] %v1944_v3  ;;  %v1980_v3 = vld [vmem:[#allocation7 + $0x1c8] sm:$0xff]   ;;  %v1982_v45 = vld [vmem:[#allocation7 + $0x1d0] sm:$0xff]  }
  0x26   :  { %1270 = vmatpush.bf16.msk.msra.mxu0 %vm1269_vm14, %v1721_v9  ;;  %1602 = vmatpush.bf16.msk.msra.mxu1 %vm1269_vm14, %v1721_v9  ;;  %3536 = vst [vmem:[#allocation16_spill] sm:$0xff] %v1950_v44  ;;  %v1988_v44 = vld [vmem:[#allocation7 + $0x1d8] sm:$0xff]   ;;  %v1994_v46 = vld [vmem:[#allocation7 + $0x1e8] sm:$0xff]   ;;  %vm1182_vm14 = vcmask 1047559  }
  0x27   :  { %3537 = vst [vmem:[#allocation17_spill] sm:$0xff] %v1952_v1  ;;  %v3556_v1 = vunpack.c.l.bf16 %v1774_v29 }
  0x28   :  { %3538 = vst [vmem:[#allocation18_spill] sm:$0xff] %v1958_v38  ;;  %v1992_v38 = vld [vmem:[#allocation7 + $0x1e0] sm:$0xff]  }
  0x29   :  { %3539 = vst [vmem:[#allocation19_spill] sm:$0xff] %v1960_v60  ;;  %v3546_v60 = vunpack.c.l.bf16 %v1758_v21 }
  0x2a   :  { %1272 = vmatpush.bf16.msk.msra.mxu0 %vm1271_vm1, %v1721_v9  ;;  %1603 = vmatpush.bf16.msk.msra.mxu1 %vm1271_vm1, %v1721_v9  ;;  %3540 = vst [vmem:[#allocation20_spill] sm:$0xff] %v1968_v58  ;;  %v2000_v58 = vld [vmem:[#allocation7 + $0x1f0] sm:$0xff]  }
  0x2b   :  { %3541 = vst [vmem:[#allocation21_spill] sm:$0xff] %v1974_v5 }
  0x2c   :  { %3542 = vst [vmem:[#allocation22_spill] sm:$0xff] %v1980_v3 }
  0x2d   :  { %3543 = vst [vmem:[#allocation23_spill] sm:$0xff] %v1982_v45 }
  0x2e   :  { %1274 = vmatpush.bf16.msk.msra.mxu0 %vm1273_vm4, %v1721_v9  ;;  %1604 = vmatpush.bf16.msk.msra.mxu1 %vm1273_vm4, %v1721_v9  ;;  %3544 = vst [vmem:[#allocation24_spill] sm:$0xff] %v2000_v58 }
  0x32   :  { %1276 = vmatpush.bf16.msk.msra.mxu0 %vm1275_vm7, %v1721_v9  ;;  %1605 = vmatpush.bf16.msk.msra.mxu1 %vm1275_vm7, %v1721_v9  ;;  %v1920_v9 = vld [vmem:[#allocation7 + $0x158] sm:$0xff]  }
  0x35   :  { %159 = vmatmul.bf16.vlgmr.msra.gmra.mxu0 %v1277_v19  ;;  %164 = vmatmul.bf16.vlgmr.msra.gmra.mxu1 %v1278_v20  ;;  %v1872_v19 = vld [vmem:[#allocation7 + $0xf8] sm:$0xff]  }
  0x36   :  { %v1904_v20 = vld [vmem:[#allocation7 + $0x138] sm:$0xff]  }
  0xb2   :  { %v160_v51 = vpop.f32.mrf.mxu0  ;;  %v165_v32 = vpop.f32.mrf.mxu1 }
  0xb3   :  { %v170_v40 = vpack.c.bf16 %v160_v51, %v160_v51  ;;  %v172_v31 = vpack.c.bf16 %v165_v32, %v165_v32  ;;  %v2002_v51 = vld [vmem:[#allocation7 + $0x1f8] sm:$0xff]  }
  0xb4   :  { %3545 = vst [vmem:[#allocation25_spill] sm:$0xff] %v2002_v51 }
  0xb5   :  { %v2004_v32 = vunpack.c.l.bf16 %v170_v40  ;;  %v2006_v53 = vunpack.c.l.bf16 %v172_v31  ;;  %v3552_v40 = vunpack.c.l.bf16 %v1772_v28  ;;  %v3554_v31 = vunpack.c.l.bf16 %v1762_v23 }
  0xb7   :  { %v2021_v5 = vmul.f32 %v3546_v60, %v2004_v32  ;;  %v2026_v39 = vmul.f32 %v3548_v30, %v2006_v53  ;;  %v2031_v45 = vmul.f32 %v3550_v33, %v2004_v32  ;;  %v2036_v3 = vmul.f32 %v3552_v40, %v2006_v53 }
  0xb8   :  { %v2041_v60 = vmul.f32 %v3554_v31, %v2004_v32  ;;  %v2046_v30 = vmul.f32 %v3556_v1, %v2006_v53  ;;  %v3562_v31 = vunpack.c.l.bf16 %v1766_v25  ;;  %v3564_v1 = vunpack.c.l.bf16 %v1782_v35 }
  0xb9   :  { %3547 = vst [vmem:[#allocation26_spill] sm:$0xff] %v2021_v5 }
  0xba   :  { %3549 = vst [vmem:[#allocation27_spill] sm:$0xff] %v2026_v39  ;;  %v3558_v39 = vunpack.c.l.bf16 %v1764_v24  ;;  %v167_v5 = vpop.f32.mrf.mxu1 }
  0xbb   :  { %3551 = vst [vmem:[#allocation28_spill] sm:$0xff] %v2031_v45  ;;  %v3560_v45 = vunpack.c.l.bf16 %v1780_v34  ;;  %v173_v58 = vpack.c.bf16 %v167_v5, %v167_v5  ;;  %v3578_v5 = vunpack.c.l.bf16 %v1802_v49 }
  0xbc   :  { %3553 = vst [vmem:[#allocation29_spill] sm:$0xff] %v2036_v3  ;;  %v2051_v33 = vmul.f32 %v3558_v39, %v2004_v32  ;;  %v162_v3 = vpop.f32.mrf.mxu0  ;;  %v3566_v39 = vunpack.c.l.bf16 %v1768_v26 }
  0xbd   :  { %3555 = vst [vmem:[#allocation30_spill] sm:$0xff] %v2041_v60  ;;  %v2056_v40 = vmul.f32 %v3560_v45, %v2006_v53  ;;  %v2061_v60 = vmul.f32 %v3562_v31, %v2004_v32  ;;  %v3568_v45 = vunpack.c.l.bf16 %v1784_v36  ;;  %v171_v51 = vpack.c.bf16 %v162_v3, %v162_v3 }
  0xbe   :  { %3557 = vst [vmem:[#allocation31_spill] sm:$0xff] %v2046_v30  ;;  %v2066_v30 = vmul.f32 %v3564_v1, %v2006_v53  ;;  %v3570_v31 = vunpack.c.l.bf16 %v1790_v41  ;;  %v3572_v1 = vunpack.c.l.bf16 %v1792_v42 }
  0xbf   :  { %3559 = vst [vmem:[#allocation32_spill] sm:$0xff] %v2051_v33  ;;  %v2071_v33 = vmul.f32 %v3566_v39, %v2004_v32  ;;  %v3574_v39 = vunpack.c.l.bf16 %v1794_v43 }
  0xc0   :  { %3561 = vst [vmem:[#allocation33_spill] sm:$0xff] %v2056_v40  ;;  %v2076_v40 = vmul.f32 %v3568_v45, %v2006_v53  ;;  %v3576_v45 = vunpack.c.l.bf16 %v1800_v48 }
  0xc1   :  { %3563 = vst [vmem:[#allocation34_spill] sm:$0xff] %v2061_v60  ;;  %v2081_v60 = vmul.f32 %v3570_v31, %v2004_v32  ;;  %v2101_v31 = vmul.f32 %v3578_v5, %v2004_v32  ;;  %v3585_v5 = vunpack.c.l.bf16 %v1814_v57 }
  0xc2   :  { %3565 = vst [vmem:[#allocation35_spill] sm:$0xff] %v2066_v30  ;;  %v2086_v30 = vmul.f32 %v3572_v1, %v2006_v53  ;;  %v2096_v3 = vmul.f32 %v3576_v45, %v2006_v53  ;;  %v3583_v45 = vunpack.c.l.bf16 %v1812_v56 }
  0xc3   :  { %3567 = vst [vmem:[#allocation36_spill] sm:$0xff] %v2071_v33  ;;  %v2091_v33 = vmul.f32 %v3574_v39, %v2004_v32  ;;  %v3581_v39 = vunpack.c.l.bf16 %v1810_v55 }
  0xc4   :  { %3569 = vst [vmem:[#allocation37_spill] sm:$0xff] %v2076_v40  ;;  %v2110_v40 = vunpack.c.l.bf16 %v173_v58 }
  0xc5   :  { %3571 = vst [vmem:[#allocation38_spill] sm:$0xff] %v2081_v60  ;;  %v3580_v60 = vunpack.c.l.bf16 %v1804_v50 }
  0xc6   :  { %3573 = vst [vmem:[#allocation39_spill] sm:$0xff] %v2086_v30  ;;  %v2108_v30 = vunpack.c.l.bf16 %v171_v51  ;;  %v3587_v51 = vunpack.c.l.bf16 %v1820_v62 }
  0xc7   :  { %3575 = vst [vmem:[#allocation40_spill] sm:$0xff] %v2091_v33  ;;  %v2106_v1 = vmul.f32 %v3580_v60, %v2006_v53  ;;  %v2115_v33 = vmul.f32 %v3581_v39, %v2004_v32  ;;  %v3589_v60 = vunpack.c.l.bf16 %v1822_v63 }
  0xc8   :  { %3577 = vst [vmem:[#allocation41_spill] sm:$0xff] %v2096_v3  ;;  %v2120_v3 = vmul.f32 %v3583_v45, %v2006_v53  ;;  %v2130_v58 = vmul.f32 %v3587_v51, %v2006_v53 }
  0xc9   :  { %3579 = vst [vmem:[#allocation42_spill] sm:$0xff] %v2101_v31  ;;  %v2125_v31 = vmul.f32 %v3585_v5, %v2004_v32  ;;  %v2135_v39 = vmul.f32 %v3589_v60, %v2004_v32 }
  0xca   :  { %3582 = vst [vmem:[#allocation43_spill] sm:$0xff] %v2115_v33  ;;  %v3591_v33 = vunpack.c.l.bf16 %v1824_v0 }
  0xcb   :  { %3584 = vst [vmem:[#allocation44_spill] sm:$0xff] %v2120_v3  ;;  %v3592_v3 = vunpack.c.h.bf16 %v1758_v21  ;;  %v3596_v21 = vunpack.c.h.bf16 %v1762_v23  ;;  %v3600_v23 = vunpack.c.h.bf16 %v1766_v25  ;;  %v3604_v25 = vunpack.c.h.bf16 %v1790_v41 }
  0xcc   :  { %3586 = vst [vmem:[#allocation45_spill] sm:$0xff] %v2125_v31  ;;  %v2140_v45 = vmul.f32 %v3591_v33, %v2006_v53  ;;  %v3593_v31 = vunpack.c.h.bf16 %v1770_v27  ;;  %v3597_v27 = vunpack.c.h.bf16 %v1774_v29  ;;  %v3601_v29 = vunpack.c.h.bf16 %v1782_v35 }
  0xcd   :  { %3588 = vst [vmem:[#allocation46_spill] sm:$0xff] %v2130_v58  ;;  %v2145_v5 = vmul.f32 %v3592_v3, %v2108_v30  ;;  %v3594_v58 = vunpack.c.h.bf16 %v1760_v22  ;;  %v2165_v3 = vmul.f32 %v3596_v21, %v2108_v30  ;;  %v3598_v22 = vunpack.c.h.bf16 %v1764_v24 }
  0xce   :  { %3590 = vst [vmem:[#allocation47_spill] sm:$0xff] %v2135_v39  ;;  %v2150_v51 = vmul.f32 %v3593_v31, %v2110_v40  ;;  %v3595_v39 = vunpack.c.h.bf16 %v1772_v28  ;;  %v2170_v31 = vmul.f32 %v3597_v27, %v2110_v40  ;;  %v3599_v28 = vunpack.c.h.bf16 %v1780_v34 }
  0xcf   :  { %v2155_v60 = vmul.f32 %v3594_v58, %v2108_v30  ;;  %v2175_v58 = vmul.f32 %v3598_v22, %v2108_v30  ;;  %v2185_v21 = vmul.f32 %v3600_v23, %v2108_v30  ;;  %v2190_v27 = vmul.f32 %v3601_v29, %v2110_v40 }
  0xd0   :  { %v2160_v33 = vmul.f32 %v3595_v39, %v2110_v40  ;;  %v2180_v39 = vmul.f32 %v3599_v28, %v2110_v40  ;;  %v3602_v24 = vunpack.c.h.bf16 %v1768_v26  ;;  %v3603_v34 = vunpack.c.h.bf16 %v1784_v36 }
  0xd1   :  { %v2205_v23 = vmul.f32 %v3604_v25, %v2108_v30  ;;  %v3605_v35 = vunpack.c.h.bf16 %v1792_v42  ;;  %v3606_v26 = vunpack.c.h.bf16 %v1794_v43  ;;  %v3607_v36 = vunpack.c.h.bf16 %v1800_v48 }
  0xd2   :  { %v2195_v22 = vmul.f32 %v3602_v24, %v2108_v30  ;;  %v2200_v28 = vmul.f32 %v3603_v34, %v2110_v40  ;;  %v3608_v41 = vunpack.c.h.bf16 %v1802_v49  ;;  %v3609_v42 = vunpack.c.h.bf16 %v1804_v50 }
  0xd3   :  { %v2210_v29 = vmul.f32 %v3605_v35, %v2110_v40  ;;  %v2215_v24 = vmul.f32 %v3606_v26, %v2108_v30  ;;  %v2220_v34 = vmul.f32 %v3607_v36, %v2110_v40  ;;  %v3610_v43 = vunpack.c.h.bf16 %v1810_v55 }
  0xd4   :  { %v2225_v25 = vmul.f32 %v3608_v41, %v2108_v30  ;;  %v2230_v35 = vmul.f32 %v3609_v42, %v2110_v40  ;;  %v3611_v48 = vunpack.c.h.bf16 %v1812_v56  ;;  %v3612_v49 = vunpack.c.h.bf16 %v1814_v57 }
  0xd5   :  { %v2235_v26 = vmul.f32 %v3610_v43, %v2108_v30  ;;  %v3613_v50 = vunpack.c.h.bf16 %v1820_v62  ;;  %v3614_v55 = vunpack.c.h.bf16 %v1822_v63  ;;  %v3615_v56 = vunpack.c.h.bf16 %v1824_v0 }
  0xd6   :  { %v2240_v36 = vmul.f32 %v3611_v48, %v2110_v40  ;;  %v2245_v41 = vmul.f32 %v3612_v49, %v2108_v30  ;;  %v3617_v57 = vunpack.c.l.bf16 %v1846_v10  ;;  %v3618_v62 = vunpack.c.h.bf16 %v1846_v10 }
  0xd7   :  { %v2250_v42 = vmul.f32 %v3613_v50, %v2110_v40  ;;  %v2255_v43 = vmul.f32 %v3614_v55, %v2108_v30  ;;  %v2260_v48 = vmul.f32 %v3615_v56, %v2110_v40  ;;  %v3620_v63 = vunpack.c.l.bf16 %v1848_v11 }
  0xd8   :  { %v2265_v49 = vmul.f32 %v3617_v57, %v2004_v32  ;;  %v2270_v50 = vmul.f32 %v3618_v62, %v2108_v30  ;;  %v3621_v0 = vunpack.c.h.bf16 %v1848_v11  ;;  %v3624_v10 = vunpack.c.h.bf16 %v1854_v12 }
  0xd9   :  { %3616 = vst [vmem:[#allocation48_spill] sm:$0xff] %v2260_v48  ;;  %v2275_v55 = vmul.f32 %v3620_v63, %v2006_v53  ;;  %v3623_v48 = vunpack.c.l.bf16 %v1854_v12  ;;  %v3627_v11 = vunpack.c.h.bf16 %v1856_v17  ;;  %v3630_v12 = vunpack.c.h.bf16 %v1862_v8 }
  0xda   :  { %3619 = vst [vmem:[#allocation49_spill] sm:$0xff] %v2270_v50  ;;  %v2280_v56 = vmul.f32 %v3621_v0, %v2110_v40  ;;  %v2290_v62 = vmul.f32 %v3624_v10, %v2108_v30  ;;  %v3626_v50 = vunpack.c.l.bf16 %v1856_v17  ;;  %v3633_v17 = vunpack.c.h.bf16 %v1864_v13 }
  0xdb   :  { %v2285_v57 = vmul.f32 %v3623_v48, %v2004_v32  ;;  %v2300_v0 = vmul.f32 %v3627_v11, %v2110_v40  ;;  %v2310_v10 = vmul.f32 %v3630_v12, %v2108_v30 }
  0xdc   :  { %3622 = vst [vmem:[#allocation50_spill] sm:$0xff] %v2280_v56  ;;  %v2295_v63 = vmul.f32 %v3626_v50, %v2006_v53  ;;  %v3629_v56 = vunpack.c.l.bf16 %v1862_v8  ;;  %v2320_v11 = vmul.f32 %v3633_v17, %v2110_v40  ;;  %v3636_v8 = vunpack.c.h.bf16 %v1870_v6 }
  0xdd   :  { %3625 = vst [vmem:[#allocation51_spill] sm:$0xff] %v2290_v62  ;;  %v3632_v62 = vunpack.c.l.bf16 %v1864_v13  ;;  %v3639_v13 = vunpack.c.h.bf16 %v1872_v19 }
  0xde   :  { %3628 = vst [vmem:[#allocation52_spill] sm:$0xff] %v2300_v0  ;;  %v2305_v48 = vmul.f32 %v3629_v56, %v2004_v32  ;;  %v3635_v0 = vunpack.c.l.bf16 %v1870_v6  ;;  %v2330_v12 = vmul.f32 %v3636_v8, %v2108_v30  ;;  %v3642_v6 = vunpack.c.h.bf16 %v1878_v4 }
  0xdf   :  { %3631 = vst [vmem:[#allocation53_spill] sm:$0xff] %v2310_v10  ;;  %v2315_v50 = vmul.f32 %v3632_v62, %v2006_v53  ;;  %v3638_v10 = vunpack.c.l.bf16 %v1872_v19  ;;  %v2340_v17 = vmul.f32 %v3639_v13, %v2110_v40  ;;  %v3645_v19 = vunpack.c.h.bf16 %v1880_v15 }
  0xe0   :  { %3634 = vst [vmem:[#allocation54_spill] sm:$0xff] %v2320_v11  ;;  %v2325_v56 = vmul.f32 %v3635_v0, %v2004_v32  ;;  %v3641_v11 = vunpack.c.l.bf16 %v1878_v4  ;;  %v2350_v8 = vmul.f32 %v3642_v6, %v2108_v30  ;;  %v3648_v4 = vunpack.c.h.bf16 %v1886_v2 }
  0xe1   :  { %3637 = vst [vmem:[#allocation55_spill] sm:$0xff] %v2330_v12  ;;  %v2335_v62 = vmul.f32 %v3638_v10, %v2006_v53  ;;  %v3644_v12 = vunpack.c.l.bf16 %v1880_v15  ;;  %v2360_v13 = vmul.f32 %v3645_v19, %v2110_v40  ;;  %v3651_v15 = vunpack.c.h.bf16 %v1888_v18 }
  0xe2   :  { %3640 = vst [vmem:[#allocation56_spill] sm:$0xff] %v2340_v17  ;;  %v2345_v0 = vmul.f32 %v3641_v11, %v2004_v32  ;;  %v3647_v17 = vunpack.c.l.bf16 %v1886_v2  ;;  %v2370_v6 = vmul.f32 %v3648_v4, %v2108_v30  ;;  %v3654_v2 = vunpack.c.h.bf16 %v1894_v61 }
  0xe3   :  { %3643 = vst [vmem:[#allocation57_spill] sm:$0xff] %v2350_v8  ;;  %v2355_v10 = vmul.f32 %v3644_v12, %v2006_v53  ;;  %v3650_v8 = vunpack.c.l.bf16 %v1888_v18  ;;  %v2380_v19 = vmul.f32 %v3651_v15, %v2110_v40  ;;  %v3657_v18 = vunpack.c.h.bf16 %v1896_v14 }
  0xe4   :  { %3646 = vst [vmem:[#allocation58_spill] sm:$0xff] %v2360_v13  ;;  %v2365_v11 = vmul.f32 %v3647_v17, %v2004_v32  ;;  %v3653_v13 = vunpack.c.l.bf16 %v1894_v61  ;;  %v2390_v4 = vmul.f32 %v3654_v2, %v2108_v30  ;;  %v3660_v61 = vunpack.c.h.bf16 %v1902_v59 }
  0xe5   :  { %3649 = vst [vmem:[#allocation59_spill] sm:$0xff] %v2370_v6  ;;  %v2375_v12 = vmul.f32 %v3650_v8, %v2006_v53  ;;  %v3656_v6 = vunpack.c.l.bf16 %v1896_v14  ;;  %v2400_v15 = vmul.f32 %v3657_v18, %v2110_v40  ;;  %v3663_v14 = vunpack.c.h.bf16 %v1904_v20 }
  0xe6   :  { %3652 = vst [vmem:[#allocation60_spill] sm:$0xff] %v2380_v19  ;;  %v2385_v17 = vmul.f32 %v3653_v13, %v2004_v32  ;;  %v3659_v19 = vunpack.c.l.bf16 %v1902_v59  ;;  %v2410_v2 = vmul.f32 %v3660_v61, %v2108_v30  ;;  %v3666_v59 = vunpack.c.h.bf16 %v1910_v54 }
  0xe7   :  { %3655 = vst [vmem:[#allocation61_spill] sm:$0xff] %v2390_v4  ;;  %v2395_v8 = vmul.f32 %v3656_v6, %v2006_v53  ;;  %v3662_v4 = vunpack.c.l.bf16 %v1904_v20  ;;  %v2420_v18 = vmul.f32 %v3663_v14, %v2110_v40  ;;  %v3669_v20 = vunpack.c.h.bf16 %v1912_v16 }
  0xe8   :  { %3658 = vst [vmem:[#allocation62_spill] sm:$0xff] %v2400_v15  ;;  %v2405_v13 = vmul.f32 %v3659_v19, %v2004_v32  ;;  %v3665_v15 = vunpack.c.l.bf16 %v1910_v54  ;;  %v2430_v61 = vmul.f32 %v3666_v59, %v2108_v30  ;;  %v3672_v54 = vunpack.c.h.bf16 %v1918_v52 }
  0xe9   :  { %3661 = vst [vmem:[#allocation63_spill] sm:$0xff] %v2410_v2  ;;  %v2415_v6 = vmul.f32 %v3662_v4, %v2006_v53  ;;  %v3668_v2 = vunpack.c.l.bf16 %v1912_v16  ;;  %v2440_v14 = vmul.f32 %v3669_v20, %v2110_v40  ;;  %v3676_v16 = vunpack.c.h.bf16 %v1920_v9 }
  0xea   :  { %3664 = vst [vmem:[#allocation64_spill] sm:$0xff] %v2420_v18  ;;  %v2425_v19 = vmul.f32 %v3665_v15, %v2004_v32  ;;  %v3671_v18 = vunpack.c.l.bf16 %v1918_v52  ;;  %v2450_v59 = vmul.f32 %v3672_v54, %v2108_v30  ;;  %v3680_v52 = vunpack.c.h.bf16 %v1926_v47 }
  0xeb   :  { %3667 = vst [vmem:[#allocation65_spill] sm:$0xff] %v2430_v61  ;;  %v2435_v4 = vmul.f32 %v3668_v2, %v2006_v53  ;;  %v3674_v61 = vunpack.c.l.bf16 %v1920_v9  ;;  %v2460_v20 = vmul.f32 %v3676_v16, %v2110_v40  ;;  %v3684_v9 = vunpack.c.h.bf16 %v1928_v7 }
  0xec   :  { %3670 = vst [vmem:[#allocation66_spill] sm:$0xff] %v2440_v14  ;;  %v2445_v15 = vmul.f32 %v3671_v18, %v2004_v32  ;;  %v3678_v14 = vunpack.c.l.bf16 %v1926_v47  ;;  %v2470_v54 = vmul.f32 %v3680_v52, %v2108_v30 }
  0xed   :  { %3673 = vst [vmem:[#allocation67_spill] sm:$0xff] %v2450_v59  ;;  %v2455_v2 = vmul.f32 %v3674_v61, %v2006_v53  ;;  %v3682_v59 = vunpack.c.l.bf16 %v1928_v7  ;;  %v2480_v16 = vmul.f32 %v3684_v9, %v2110_v40 }
  0xee   :  { %3677 = vst [vmem:[#allocation69_spill] sm:$0xff] %v2460_v20  ;;  %v2465_v18 = vmul.f32 %v3678_v14, %v2004_v32  ;;  %v3686_v20 = vld [vmem:[#allocation12_spill] sm:$0xff] }
  0xef   :  { %3675 = vst [vmem:[#allocation68_spill] sm:$0xff] %v2455_v2  ;;  %v2475_v61 = vmul.f32 %v3682_v59, %v2006_v53  ;;  %v3687_v2 = vunpack.c.l.bf16 %v3686_v20  ;;  %v3689_v47 = vunpack.c.h.bf16 %v3686_v20 }
  0xf0   :  { %3679 = vst [vmem:[#allocation70_spill] sm:$0xff] %v2465_v18 }
  0xf1   :  { %3681 = vst [vmem:[#allocation71_spill] sm:$0xff] %v2470_v54  ;;  %v2485_v14 = vmul.f32 %v3687_v2, %v2004_v32  ;;  %v2490_v52 = vmul.f32 %v3689_v47, %v2108_v30  ;;  %v3691_v54 = vld [vmem:[#allocation13_spill] sm:$0xff] }
  0xf2   :  { %3683 = vst [vmem:[#allocation72_spill] sm:$0xff] %v2475_v61  ;;  %v3692_v18 = vunpack.c.l.bf16 %v3691_v54  ;;  %v3694_v7 = vunpack.c.h.bf16 %v3691_v54 }
  0xf3   :  { %3685 = vst [vmem:[#allocation73_spill] sm:$0xff] %v2480_v16  ;;  %v3696_v16 = vld [vmem:[#allocation14_spill] sm:$0xff] }
  0xf4   :  { %3688 = vst [vmem:[#allocation12_spill] sm:$0xff] %v2485_v14  ;;  %v2495_v59 = vmul.f32 %v3692_v18, %v2006_v53  ;;  %v2500_v9 = vmul.f32 %v3694_v7, %v2110_v40  ;;  %v3697_v61 = vunpack.c.l.bf16 %v3696_v16  ;;  %v3699_v20 = vunpack.c.h.bf16 %v3696_v16 }
  0xf5   :  { %3690 = vst [vmem:[#allocation74_spill] sm:$0xff] %v2490_v52  ;;  %v3701_v52 = vld [vmem:[#allocation15_spill] sm:$0xff] }
  0xf6   :  { %3693 = vst [vmem:[#allocation13_spill] sm:$0xff] %v2495_v59  ;;  %v2505_v2 = vmul.f32 %v3697_v61, %v2004_v32  ;;  %v2510_v47 = vmul.f32 %v3699_v20, %v2108_v30  ;;  %v3702_v14 = vunpack.c.l.bf16 %v3701_v52  ;;  %v3704_v54 = vunpack.c.h.bf16 %v3701_v52 }
  0xf7   :  { %3695 = vst [vmem:[#allocation75_spill] sm:$0xff] %v2500_v9  ;;  %v3706_v9 = vld [vmem:[#allocation16_spill] sm:$0xff] }
  0xf8   :  { %3698 = vst [vmem:[#allocation14_spill] sm:$0xff] %v2505_v2  ;;  %v2515_v18 = vmul.f32 %v3702_v14, %v2006_v53  ;;  %v2520_v7 = vmul.f32 %v3704_v54, %v2110_v40  ;;  %v3707_v59 = vunpack.c.l.bf16 %v3706_v9  ;;  %v3709_v16 = vunpack.c.h.bf16 %v3706_v9 }
  0xf9   :  { %3700 = vst [vmem:[#allocation76_spill] sm:$0xff] %v2510_v47  ;;  %v3711_v47 = vld [vmem:[#allocation17_spill] sm:$0xff] }
  0xfa   :  { %3703 = vst [vmem:[#allocation15_spill] sm:$0xff] %v2515_v18  ;;  %v2525_v61 = vmul.f32 %v3707_v59, %v2004_v32  ;;  %v2530_v20 = vmul.f32 %v3709_v16, %v2108_v30  ;;  %v3712_v2 = vunpack.c.l.bf16 %v3711_v47  ;;  %v3713_v52 = vunpack.c.h.bf16 %v3711_v47 }
  0xfb   :  { %3705 = vst [vmem:[#allocation77_spill] sm:$0xff] %v2520_v7  ;;  %v3715_v7 = vld [vmem:[#allocation18_spill] sm:$0xff] }
  0xfc   :  { %3708 = vst [vmem:[#allocation16_spill] sm:$0xff] %v2525_v61  ;;  %v2535_v14 = vmul.f32 %v3712_v2, %v2006_v53  ;;  %v2540_v54 = vmul.f32 %v3713_v52, %v2110_v40  ;;  %v3716_v18 = vunpack.c.l.bf16 %v3715_v7  ;;  %v3718_v9 = vunpack.c.h.bf16 %v3715_v7 }
  0xfd   :  { %3710 = vst [vmem:[#allocation78_spill] sm:$0xff] %v2530_v20  ;;  %v3720_v20 = vld [vmem:[#allocation19_spill] sm:$0xff]  ;;  %v3727_v7 = vunpack.c.h.bf16 %v1966_v37 }
  0xfe   :  { %3714 = vst [vmem:[#allocation17_spill] sm:$0xff] %v2540_v54  ;;  %v2545_v59 = vmul.f32 %v3716_v18, %v2004_v32  ;;  %v2550_v16 = vmul.f32 %v3718_v9, %v2108_v30  ;;  %v3721_v61 = vunpack.c.l.bf16 %v3720_v20  ;;  %v3723_v47 = vunpack.c.h.bf16 %v3720_v20 }
  0xff   :  { %v3725_v54 = vunpack.c.l.bf16 %v1966_v37  ;;  %v2570_v9 = vmul.f32 %v3727_v7, %v2108_v30 }
 0x100   :  { %3717 = vst [vmem:[#allocation18_spill] sm:$0xff] %v2545_v59  ;;  %v2555_v2 = vmul.f32 %v3721_v61, %v2006_v53  ;;  %v2560_v52 = vmul.f32 %v3723_v47, %v2110_v40 }
 0x101   :  { %3719 = vst [vmem:[#allocation79_spill] sm:$0xff] %v2550_v16  ;;  %v2565_v18 = vmul.f32 %v3725_v54, %v2004_v32  ;;  %v3729_v16 = vld [vmem:[#allocation20_spill] sm:$0xff] }
 0x102   :  { %3722 = vst [vmem:[#allocation19_spill] sm:$0xff] %v2555_v2  ;;  %v3730_v59 = vunpack.c.l.bf16 %v3729_v16  ;;  %v3732_v20 = vunpack.c.h.bf16 %v3729_v16 }
 0x103   :  { %3724 = vst [vmem:[#allocation80_spill] sm:$0xff] %v2560_v52  ;;  %v3734_v52 = vld [vmem:[#allocation21_spill] sm:$0xff] }
 0x104   :  { %3726 = vst [vmem:[#allocation81_spill] sm:$0xff] %v2565_v18  ;;  %v2575_v61 = vmul.f32 %v3730_v59, %v2006_v53  ;;  %v2580_v47 = vmul.f32 %v3732_v20, %v2110_v40  ;;  %v3735_v2 = vunpack.c.l.bf16 %v3734_v52  ;;  %v3736_v37 = vunpack.c.h.bf16 %v3734_v52 }
 0x105   :  { %3728 = vst [vmem:[#allocation82_spill] sm:$0xff] %v2570_v9  ;;  %v3738_v9 = vld [vmem:[#allocation22_spill] sm:$0xff] }
 0x106   :  { %3731 = vst [vmem:[#allocation20_spill] sm:$0xff] %v2575_v61  ;;  %v2585_v54 = vmul.f32 %v3735_v2, %v2004_v32  ;;  %v2590_v7 = vmul.f32 %v3736_v37, %v2108_v30  ;;  %v3739_v18 = vunpack.c.l.bf16 %v3738_v9  ;;  %v3740_v16 = vunpack.c.h.bf16 %v3738_v9 }
 0x107   :  { %3733 = vst [vmem:[#allocation83_spill] sm:$0xff] %v2580_v47  ;;  %v3742_v47 = vld [vmem:[#allocation23_spill] sm:$0xff]  ;;  %v3748_v9 = vunpack.c.h.bf16 %v1988_v44 }
 0x108   :  { %3737 = vst [vmem:[#allocation21_spill] sm:$0xff] %v2590_v7  ;;  %v2595_v59 = vmul.f32 %v3739_v18, %v2006_v53  ;;  %v2600_v20 = vmul.f32 %v3740_v16, %v2110_v40  ;;  %v3743_v61 = vunpack.c.l.bf16 %v3742_v47  ;;  %v3744_v52 = vunpack.c.h.bf16 %v3742_v47 }
 0x109   :  { %v3746_v7 = vunpack.c.l.bf16 %v1988_v44  ;;  %v2620_v16 = vmul.f32 %v3748_v9, %v2110_v40  ;;  %v3752_v47 = vunpack.c.h.bf16 %v1992_v38  ;;  %v3756_v44 = vunpack.c.h.bf16 %v1994_v46 }
 0x10a   :  { %3741 = vst [vmem:[#allocation22_spill] sm:$0xff] %v2600_v20  ;;  %v2605_v2 = vmul.f32 %v3743_v61, %v2004_v32  ;;  %v2610_v37 = vmul.f32 %v3744_v52, %v2108_v30  ;;  %v3750_v20 = vunpack.c.l.bf16 %v1992_v38 }
 0x10b   :  { %v2615_v18 = vmul.f32 %v3746_v7, %v2006_v53  ;;  %3749 = vst [vmem:[#allocation85_spill] sm:$0xff] %v2620_v16  ;;  %v2630_v52 = vmul.f32 %v3752_v47, %v2108_v30  ;;  %v2640_v9 = vmul.f32 %v3756_v44, %v2110_v40  ;;  %v3758_v16 = vld [vmem:[#allocation24_spill] sm:$0xff] }
 0x10c   :  { %3745 = vst [vmem:[#allocation23_spill] sm:$0xff] %v2610_v37  ;;  %v2625_v61 = vmul.f32 %v3750_v20, %v2004_v32  ;;  %v3754_v37 = vunpack.c.l.bf16 %v1994_v46  ;;  %v3760_v38 = vunpack.c.h.bf16 %v3758_v16 }
 0x10d   :  { %3747 = vst [vmem:[#allocation84_spill] sm:$0xff] %v2615_v18  ;;  %v3759_v18 = vunpack.c.l.bf16 %v3758_v16 }
 0x10e   :  { %3751 = vst [vmem:[#allocation86_spill] sm:$0xff] %v2625_v61  ;;  %v2635_v7 = vmul.f32 %v3754_v37, %v2006_v53  ;;  %v2650_v47 = vmul.f32 %v3760_v38, %v2108_v30  ;;  %v3766_v30 = vld [vmem:[#allocation28_spill] sm:$0xff]  ;;  %v3767_v38 = vld [vmem:[#allocation29_spill] sm:$0xff] }
 0x10f   :  { %3753 = vst [vmem:[#allocation87_spill] sm:$0xff] %v2630_v52  ;;  %v2645_v20 = vmul.f32 %v3759_v18, %v2004_v32  ;;  %v3761_v52 = vld [vmem:[#allocation25_spill] sm:$0xff]  ;;  %v3765_v32 = vld [vmem:[#allocation27_spill] sm:$0xff]  ;;  %v2672_v16 = vpack.c.bf16 %v2155_v60, %v3766_v30 }
 0x110   :  { %3755 = vst [vmem:[#allocation88_spill] sm:$0xff] %v2635_v7  ;;  %v3762_v61 = vunpack.c.l.bf16 %v3761_v52  ;;  %v3763_v46 = vunpack.c.h.bf16 %v3761_v52  ;;  %v2668_v18 = vpack.c.bf16 %v2150_v51, %v3765_v32  ;;  %v3769_v52 = vld [vmem:[#allocation31_spill] sm:$0xff]  ;;  %v3772_v32 = vld [vmem:[#allocation34_spill] sm:$0xff] }
 0x111   :  { %3757 = vst [vmem:[#allocation89_spill] sm:$0xff] %v2640_v9  ;;  %v3764_v9 = vld [vmem:[#allocation26_spill] sm:$0xff]  ;;  %v3773_v30 = vld [vmem:[#allocation35_spill] sm:$0xff] }
 0x112   :  { %v2655_v37 = vmul.f32 %v3762_v61, %v2006_v53  ;;  %v2660_v44 = vmul.f32 %v3763_v46, %v2110_v40  ;;  %v2664_v7 = vpack.c.bf16 %v2145_v5, %v3764_v9  ;;  %v2676_v53 = vpack.c.bf16 %v2160_v33, %v3767_v38  ;;  %v3768_v61 = vld [vmem:[#allocation30_spill] sm:$0xff]  ;;  %v3770_v9 = vld [vmem:[#allocation32_spill] sm:$0xff]  ;;  %v3771_v46 = vld [vmem:[#allocation33_spill] sm:$0xff] }
 0x113   :  { %v2680_v40 = vpack.c.bf16 %v2165_v3, %v3768_v61  ;;  %v2684_v5 = vpack.c.bf16 %v2170_v31, %v3769_v52  ;;  %v2688_v51 = vpack.c.bf16 %v2175_v58, %v3770_v9  ;;  %v2692_v60 = vpack.c.bf16 %v2180_v39, %v3771_v46  ;;  %v3774_v38 = vld [vmem:[#allocation36_spill] sm:$0xff]  ;;  %v3775_v61 = vld [vmem:[#allocation37_spill] sm:$0xff]  ;;  %v3776_v52 = vld [vmem:[#allocation38_spill] sm:$0xff] }
 0x114   :  { %v2696_v33 = vpack.c.bf16 %v2185_v21, %v3772_v32  ;;  %v2700_v3 = vpack.c.bf16 %v2190_v27, %v3773_v30  ;;  %v2704_v31 = vpack.c.bf16 %v2195_v22, %v3774_v38  ;;  %v2708_v58 = vpack.c.bf16 %v2200_v28, %v3775_v61  ;;  %v3777_v9 = vld [vmem:[#allocation39_spill] sm:$0xff]  ;;  %v3778_v46 = vld [vmem:[#allocation40_spill] sm:$0xff]  ;;  %v3779_v32 = vld [vmem:[#allocation41_spill] sm:$0xff] }
 0x115   :  { %v2712_v39 = vpack.c.bf16 %v2205_v23, %v3776_v52  ;;  %v2716_v21 = vpack.c.bf16 %v2210_v29, %v3777_v9  ;;  %v2720_v27 = vpack.c.bf16 %v2215_v24, %v3778_v46  ;;  %v2724_v22 = vpack.c.bf16 %v2220_v34, %v3779_v32  ;;  %v3780_v30 = vld [vmem:[#allocation42_spill] sm:$0xff]  ;;  %v3781_v38 = vld [vmem:[#allocation43_spill] sm:$0xff]  ;;  %v3782_v61 = vld [vmem:[#allocation44_spill] sm:$0xff] }
 0x116   :  { %v2728_v28 = vpack.c.bf16 %v2225_v25, %v3780_v30  ;;  %v2732_v23 = vpack.c.bf16 %v2230_v35, %v2106_v1  ;;  %v2736_v29 = vpack.c.bf16 %v2235_v26, %v3781_v38  ;;  %v2740_v24 = vpack.c.bf16 %v2240_v36, %v3782_v61  ;;  %v3783_v52 = vld [vmem:[#allocation45_spill] sm:$0xff]  ;;  %v3784_v9 = vld [vmem:[#allocation46_spill] sm:$0xff]  ;;  %v3785_v46 = vld [vmem:[#allocation47_spill] sm:$0xff] }
 0x117   :  { %v2744_v34 = vpack.c.bf16 %v2245_v41, %v3783_v52  ;;  %v2748_v25 = vpack.c.bf16 %v2250_v42, %v3784_v9  ;;  %v2752_v1 = vpack.c.bf16 %v2255_v43, %v3785_v46  ;;  %v3786_v35 = vld [vmem:[#allocation48_spill] sm:$0xff]  ;;  %v3787_v32 = vld [vmem:[#allocation49_spill] sm:$0xff]  ;;  %v3788_v30 = vld [vmem:[#allocation50_spill] sm:$0xff] }
 0x118   :  { %v2756_v26 = vpack.c.bf16 %v3786_v35, %v2140_v45  ;;  %v2760_v36 = vpack.c.bf16 %v3787_v32, %v2265_v49  ;;  %v2764_v41 = vpack.c.bf16 %v3788_v30, %v2275_v55  ;;  %v3789_v38 = vld [vmem:[#allocation51_spill] sm:$0xff]  ;;  %v3790_v61 = vld [vmem:[#allocation52_spill] sm:$0xff]  ;;  %v3791_v52 = vld [vmem:[#allocation53_spill] sm:$0xff] }
 0x119   :  { %v2768_v42 = vpack.c.bf16 %v3789_v38, %v2285_v57  ;;  %v2772_v43 = vpack.c.bf16 %v3790_v61, %v2295_v63  ;;  %v2776_v45 = vpack.c.bf16 %v3791_v52, %v2305_v48  ;;  %v3792_v9 = vld [vmem:[#allocation54_spill] sm:$0xff]  ;;  %v3793_v46 = vld [vmem:[#allocation55_spill] sm:$0xff]  ;;  %v3794_v35 = vld [vmem:[#allocation56_spill] sm:$0xff] }
 0x11a   :  { %v2780_v49 = vpack.c.bf16 %v3792_v9, %v2315_v50  ;;  %v2784_v55 = vpack.c.bf16 %v3793_v46, %v2325_v56  ;;  %v2788_v57 = vpack.c.bf16 %v3794_v35, %v2335_v62  ;;  %v3795_v32 = vld [vmem:[#allocation57_spill] sm:$0xff]  ;;  %v3796_v30 = vld [vmem:[#allocation58_spill] sm:$0xff]  ;;  %v3798_v38 = vld [vmem:[#allocation59_spill] sm:$0xff] }
 0x11b   :  { %v2792_v63 = vpack.c.bf16 %v3795_v32, %v2345_v0  ;;  %v2796_v48 = vpack.c.bf16 %v3796_v30, %v2355_v10  ;;  %v2800_v50 = vpack.c.bf16 %v3798_v38, %v2365_v11  ;;  %v3799_v61 = vld [vmem:[#allocation60_spill] sm:$0xff]  ;;  %v3801_v52 = vld [vmem:[#allocation61_spill] sm:$0xff]  ;;  %v3802_v9 = vld [vmem:[#allocation62_spill] sm:$0xff] }
 0x11c   :  { %v2804_v56 = vpack.c.bf16 %v3799_v61, %v2375_v12  ;;  %v2808_v62 = vpack.c.bf16 %v3801_v52, %v2385_v17  ;;  %v2812_v0 = vpack.c.bf16 %v3802_v9, %v2395_v8  ;;  %v3804_v46 = vld [vmem:[#allocation63_spill] sm:$0xff]  ;;  %v3805_v35 = vld [vmem:[#allocation64_spill] sm:$0xff]  ;;  %v3807_v32 = vld [vmem:[#allocation65_spill] sm:$0xff] }
 0x11d   :  { %3797 = vst [vmem:[#allocation24_spill] sm:$0xff] %v2796_v48  ;;  %v2816_v10 = vpack.c.bf16 %v3804_v46, %v2405_v13  ;;  %v2820_v11 = vpack.c.bf16 %v3805_v35, %v2415_v6  ;;  %v2824_v12 = vpack.c.bf16 %v3807_v32, %v2425_v19  ;;  %v3809_v30 = vld [vmem:[#allocation66_spill] sm:$0xff]  ;;  %v3811_v38 = vld [vmem:[#allocation67_spill] sm:$0xff]  ;;  %v3813_v61 = vld [vmem:[#allocation68_spill] sm:$0xff] }
 0x11e   :  { %3800 = vst [vmem:[#allocation25_spill] sm:$0xff] %v2804_v56  ;;  %v2828_v17 = vpack.c.bf16 %v3809_v30, %v2435_v4  ;;  %v2832_v8 = vpack.c.bf16 %v3811_v38, %v2445_v15  ;;  %v3814_v52 = vld [vmem:[#allocation69_spill] sm:$0xff]  ;;  %v3816_v9 = vld [vmem:[#allocation70_spill] sm:$0xff]  ;;  %v3817_v46 = vld [vmem:[#allocation71_spill] sm:$0xff] }
 0x11f   :  { %3803 = vst [vmem:[#allocation26_spill] sm:$0xff] %v2812_v0  ;;  %v2836_v13 = vpack.c.bf16 %v3814_v52, %v3813_v61  ;;  %v2840_v6 = vpack.c.bf16 %v3817_v46, %v3816_v9  ;;  %v3819_v35 = vld [vmem:[#allocation72_spill] sm:$0xff]  ;;  %v3824_v30 = vld [vmem:[#allocation13_spill] sm:$0xff]  ;;  %v3827_v38 = vld [vmem:[#allocation14_spill] sm:$0xff] }
 0x120   :  { %3806 = vst [vmem:[#allocation27_spill] sm:$0xff] %v2820_v11  ;;  %v3820_v11 = vld [vmem:[#allocation73_spill] sm:$0xff]  ;;  %v3821_v32 = vld [vmem:[#allocation12_spill] sm:$0xff]  ;;  %v3830_v52 = vld [vmem:[#allocation15_spill] sm:$0xff] }
 0x121   :  { %3808 = vst [vmem:[#allocation28_spill] sm:$0xff] %v2824_v12  ;;  %v2844_v19 = vpack.c.bf16 %v3820_v11, %v3819_v35  ;;  %v3822_v12 = vld [vmem:[#allocation74_spill] sm:$0xff]  ;;  %v3833_v46 = vld [vmem:[#allocation16_spill] sm:$0xff]  ;;  %v3835_v35 = vld [vmem:[#allocation17_spill] sm:$0xff] }
 0x122   :  { %3810 = vst [vmem:[#allocation29_spill] sm:$0xff] %v2828_v17  ;;  %v2848_v4 = vpack.c.bf16 %v3822_v12, %v3821_v32  ;;  %v3825_v17 = vld [vmem:[#allocation75_spill] sm:$0xff]  ;;  %v2868_v12 = vpack.c.bf16 %v3835_v35, %v2535_v14  ;;  %v3837_v32 = vld [vmem:[#allocation18_spill] sm:$0xff] }
 0x123   :  { %3812 = vst [vmem:[#allocation30_spill] sm:$0xff] %v2832_v8  ;;  %v2852_v15 = vpack.c.bf16 %v3825_v17, %v3824_v30  ;;  %v3828_v8 = vld [vmem:[#allocation76_spill] sm:$0xff]  ;;  %v3839_v30 = vld [vmem:[#allocation19_spill] sm:$0xff]  ;;  %v3849_v35 = vld [vmem:[#allocation22_spill] sm:$0xff] }
 0x124   :  { %3815 = vst [vmem:[#allocation31_spill] sm:$0xff] %v2836_v13  ;;  %v2856_v61 = vpack.c.bf16 %v3828_v8, %v3827_v38  ;;  %v3831_v13 = vld [vmem:[#allocation77_spill] sm:$0xff] }
 0x125   :  { %3818 = vst [vmem:[#allocation32_spill] sm:$0xff] %v2840_v6  ;;  %v2860_v9 = vpack.c.bf16 %v3831_v13, %v3830_v52  ;;  %v3834_v6 = vld [vmem:[#allocation78_spill] sm:$0xff]  ;;  %v3842_v38 = vld [vmem:[#allocation81_spill] sm:$0xff]  ;;  %v3845_v52 = vld [vmem:[#allocation20_spill] sm:$0xff] }
 0x126   :  { %3823 = vst [vmem:[#allocation33_spill] sm:$0xff] %v2848_v4  ;;  %v2864_v11 = vpack.c.bf16 %v3834_v6, %v3833_v46  ;;  %v3838_v4 = vld [vmem:[#allocation79_spill] sm:$0xff]  ;;  %v3848_v46 = vld [vmem:[#allocation21_spill] sm:$0xff] }
 0x127   :  { %3826 = vst [vmem:[#allocation34_spill] sm:$0xff] %v2852_v15  ;;  %v2872_v17 = vpack.c.bf16 %v3838_v4, %v3837_v32  ;;  %v3840_v15 = vld [vmem:[#allocation80_spill] sm:$0xff]  ;;  %v2888_v14 = vpack.c.bf16 %v3848_v46, %v2585_v54  ;;  %v2892_v4 = vpack.c.bf16 %v3849_v35, %v2595_v59  ;;  %v3851_v32 = vld [vmem:[#allocation23_spill] sm:$0xff]  ;;  %v2912_v59 = vpack.c.bf16 %v2650_v47, %v2645_v20 }
 0x128   :  { %3829 = vst [vmem:[#allocation35_spill] sm:$0xff] %v2856_v61  ;;  %v2876_v8 = vpack.c.bf16 %v3840_v15, %v3839_v30  ;;  %v3843_v61 = vld [vmem:[#allocation82_spill] sm:$0xff]  ;;  %v2896_v15 = vpack.c.bf16 %v3851_v32, %v2605_v2  ;;  %v3853_v30 = vld [vmem:[#allocation84_spill] sm:$0xff]  ;;  %v2916_v2 = vpack.c.bf16 %v2660_v44, %v2655_v37  ;;  %v3877_v47 = vunpack.c.l.bf16 %v2664_v7 }
 0x129   :  { %3832 = vst [vmem:[#allocation36_spill] sm:$0xff] %v2860_v9  ;;  %v2880_v13 = vpack.c.bf16 %v3843_v61, %v3842_v38  ;;  %v3846_v9 = vld [vmem:[#allocation83_spill] sm:$0xff]  ;;  %v3856_v38 = vld [vmem:[#allocation86_spill] sm:$0xff]  ;;  %v3878_v37 = vunpack.c.h.bf16 %v2664_v7  ;;  %v3879_v44 = vunpack.c.l.bf16 %v2672_v16  ;;  %v3882_v35 = vunpack.c.h.bf16 %v2680_v40 }
 0x12a   :  { %3836 = vst [vmem:[#allocation37_spill] sm:$0xff] %v2868_v12  ;;  %v2884_v6 = vpack.c.bf16 %v3846_v9, %v3845_v52  ;;  %v3859_v52 = vld [vmem:[#allocation88_spill] sm:$0xff]  ;;  %v3886_v7 = vunpack.c.h.bf16 %v2696_v33 }
 0x12b   :  { %3841 = vst [vmem:[#allocation38_spill] sm:$0xff] %v2876_v8  ;;  %v3854_v8 = vld [vmem:[#allocation85_spill] sm:$0xff] }
 0x12c   :  { %3844 = vst [vmem:[#allocation39_spill] sm:$0xff] %v2880_v13  ;;  %v2900_v61 = vpack.c.bf16 %v3854_v8, %v3853_v30  ;;  %v3857_v13 = vld [vmem:[#allocation87_spill] sm:$0xff]  ;;  %v3865_v8 = vld [vmem:[#allocation28_spill] sm:$0xff]  ;;  %v3884_v30 = vunpack.c.h.bf16 %v2688_v51 }
 0x12d   :  { %3847 = vst [vmem:[#allocation40_spill] sm:$0xff] %v2884_v6  ;;  %v2904_v9 = vpack.c.bf16 %v3857_v13, %v3856_v38  ;;  %v3860_v6 = vld [vmem:[#allocation89_spill] sm:$0xff]  ;;  %v3869_v48 = vld [vmem:[#allocation32_spill] sm:$0xff]  ;;  %v3880_v38 = vunpack.c.h.bf16 %v2672_v16  ;;  %v3881_v13 = vunpack.c.l.bf16 %v2680_v40  ;;  %v3888_v16 = vunpack.c.h.bf16 %v2704_v31 }
 0x12e   :  { %3850 = vst [vmem:[#allocation41_spill] sm:$0xff] %v2892_v4  ;;  %v2908_v54 = vpack.c.bf16 %v3860_v6, %v3859_v52  ;;  %v3870_v32 = vld [vmem:[#allocation33_spill] sm:$0xff]  ;;  %v3883_v6 = vunpack.c.l.bf16 %v2688_v51  ;;  %v3890_v40 = vunpack.c.h.bf16 %v2712_v39  ;;  %v3892_v51 = vunpack.c.h.bf16 %v2720_v27 }
 0x12f   :  { %3852 = vst [vmem:[#allocation42_spill] sm:$0xff] %v2896_v15  ;;  %v763_v52 = vadd.f32 %v3880_v38, %v3879_v44  ;;  %v3889_v38 = vunpack.c.l.bf16 %v2712_v39  ;;  %v3897_v39 = vunpack.c.l.bf16 %v2700_v3 }
 0x130   :  { %3855 = vst [vmem:[#allocation43_spill] sm:$0xff] %v2900_v61  ;;  %v754_v61 = vadd.f32 %v3878_v37, %v3877_v47  ;;  %v781_v20 = vadd.f32 %v3884_v30, %v3883_v6  ;;  %v3887_v37 = vunpack.c.l.bf16 %v2704_v31  ;;  %v3893_v30 = vunpack.c.l.bf16 %v2668_v18 }
 0x131   :  { %3858 = vst [vmem:[#allocation44_spill] sm:$0xff] %v2904_v9 }
 0x132   :  { %3861 = vst [vmem:[#allocation45_spill] sm:$0xff] %v2908_v54  ;;  %v772_v54 = vadd.f32 %v3882_v35, %v3881_v13  ;;  %v799_v44 = vadd.f32 %v3888_v16, %v3887_v37  ;;  %v808_v35 = vadd.f32 %v3890_v40, %v3889_v38  ;;  %v3891_v13 = vunpack.c.l.bf16 %v2720_v27 }
 0x133   :  { %3862 = vst [vmem:[#allocation46_spill] sm:$0xff] %v2912_v59  ;;  %v3875_v56 = vld [vmem:[#allocation39_spill] sm:$0xff]  ;;  %v755_v4 = vadd.f32 %v754_v61, %v3893_v30  ;;  %v3896_v37 = vunpack.c.l.bf16 %v2692_v60  ;;  %v3898_v40 = vunpack.c.l.bf16 %v2708_v58  ;;  %v3899_v27 = vunpack.c.l.bf16 %v2716_v21 }
 0x134   :  { %3863 = vst [vmem:[#allocation47_spill] sm:$0xff] %v2916_v2  ;;  %v3885_v2 = vunpack.c.l.bf16 %v2696_v33  ;;  %v817_v6 = vadd.f32 %v3892_v51, %v3891_v13  ;;  %v3894_v33 = vunpack.c.l.bf16 %v2676_v53  ;;  %v3900_v61 = vunpack.c.l.bf16 %v2724_v22 }
 0x135   :  { %v782_v16 = vadd.f32 %v781_v20, %v3896_v37  ;;  %v800_v0 = vadd.f32 %v799_v44, %v3898_v40  ;;  %v809_v13 = vadd.f32 %v808_v35, %v3899_v27  ;;  %v3903_v20 = vunpack.c.h.bf16 %v2684_v5 }
 0x136   :  { %v790_v47 = vadd.f32 %v3886_v7, %v3885_v2  ;;  %v764_v2 = vadd.f32 %v763_v52, %v3894_v33  ;;  %v3895_v7 = vunpack.c.l.bf16 %v2684_v5  ;;  %v818_v51 = vadd.f32 %v817_v6, %v3900_v61 }
 0x137   :  { %v3901_v52 = vunpack.c.h.bf16 %v2668_v18  ;;  %v3905_v44 = vunpack.c.h.bf16 %v2700_v3  ;;  %v3906_v35 = vunpack.c.h.bf16 %v2708_v58  ;;  %v3907_v6 = vunpack.c.h.bf16 %v2716_v21 }
 0x138   :  { %v773_v31 = vadd.f32 %v772_v54, %v3895_v7  ;;  %v791_v38 = vadd.f32 %v790_v47, %v3897_v39  ;;  %v3902_v54 = vunpack.c.h.bf16 %v2676_v53  ;;  %v3904_v47 = vunpack.c.h.bf16 %v2692_v60 }
 0x139   :  { %v756_v30 = vadd.f32 %v755_v4, %v3901_v52  ;;  %v801_v40 = vadd.f32 %v800_v0, %v3906_v35  ;;  %v810_v27 = vadd.f32 %v809_v13, %v3907_v6  ;;  %v3908_v18 = vunpack.c.h.bf16 %v2724_v22 }
 0x13a   :  { %v765_v33 = vadd.f32 %v764_v2, %v3902_v54  ;;  %v774_v7 = vadd.f32 %v773_v31, %v3903_v20  ;;  %v783_v37 = vadd.f32 %v782_v16, %v3904_v47  ;;  %v792_v39 = vadd.f32 %v791_v38, %v3905_v44 }
 0x13b   :  { %v819_v4 = vadd.f32 %v818_v51, %v3908_v18  ;;  %v757_v53 = vrot.slane %v756_v30, 4  ;;  %v802_v52 = vrot.slane %v801_v40, 4  ;;  %v811_v60 = vrot.slane %v810_v27, 4 }
 0x13c   :  { %v766_v2 = vrot.slane %v765_v33, 4  ;;  %v775_v61 = vrot.slane %v774_v7, 4  ;;  %v784_v5 = vrot.slane %v783_v37, 4  ;;  %v793_v31 = vrot.slane %v792_v39, 4 }
 0x13d   :  { %v820_v16 = vrot.slane %v819_v4, 4  ;;  %v758_v54 = vadd.f32 %v757_v53, %v756_v30  ;;  %v803_v0 = vadd.f32 %v802_v52, %v801_v40  ;;  %v812_v47 = vadd.f32 %v811_v60, %v810_v27 }
 0x13e   :  { %v767_v3 = vadd.f32 %v766_v2, %v765_v33  ;;  %v776_v38 = vadd.f32 %v775_v61, %v774_v7  ;;  %v785_v20 = vadd.f32 %v784_v5, %v783_v37  ;;  %v794_v58 = vadd.f32 %v793_v31, %v792_v39 }
 0x13f   :  { %v821_v21 = vadd.f32 %v820_v16, %v819_v4  ;;  %v759_v13 = vrot.slane %v758_v54, 2  ;;  %v804_v6 = vrot.slane %v803_v0, 2  ;;  %v813_v18 = vrot.slane %v812_v47, 2 }
 0x140   :  { %v768_v44 = vrot.slane %v767_v3, 2  ;;  %v777_v22 = vrot.slane %v776_v38, 2  ;;  %v786_v51 = vrot.slane %v785_v20, 2  ;;  %v795_v35 = vrot.slane %v794_v58, 2 }
 0x141   :  { %v822_v46 = vrot.slane %v821_v21, 2  ;;  %v760_v12 = vadd.f32 %v759_v13, %v758_v54  ;;  %v805_v33 = vadd.f32 %v804_v6, %v803_v0  ;;  %v814_v7 = vadd.f32 %v813_v18, %v812_v47 }
 0x142   :  { %v769_v59 = vadd.f32 %v768_v44, %v767_v3  ;;  %v778_v9 = vadd.f32 %v777_v22, %v776_v38  ;;  %v787_v15 = vadd.f32 %v786_v51, %v785_v20  ;;  %v796_v30 = vadd.f32 %v795_v35, %v794_v58 }
 0x143   :  { %v823_v37 = vadd.f32 %v822_v46, %v821_v21  ;;  %v761_v39 = vrot.slane %v760_v12, 1  ;;  %v806_v2 = vrot.slane %v805_v33, 1  ;;  %v815_v61 = vrot.slane %v814_v7, 1 }
 0x144   :  { %v770_v40 = vrot.slane %v769_v59, 1  ;;  %v779_v27 = vrot.slane %v778_v9, 1  ;;  %v788_v4 = vrot.slane %v787_v15, 1  ;;  %v797_v53 = vrot.slane %v796_v30, 1 }
 0x145   :  { %v824_v5 = vrot.slane %v823_v37, 1  ;;  %v3110_v31 = vadd.f32 %v761_v39, %v760_v12  ;;  %v3120_v3 = vadd.f32 %v806_v2, %v805_v33  ;;  %v3122_v46 = vadd.f32 %v815_v61, %v814_v7 }
 0x146   :  { %v3112_v52 = vadd.f32 %v770_v40, %v769_v59  ;;  %v3114_v60 = vadd.f32 %v779_v27, %v778_v9  ;;  %v3116_v16 = vadd.f32 %v788_v4, %v787_v15  ;;  %v3118_v54 = vadd.f32 %v797_v53, %v796_v30 }
 0x147   :  { %v3124_v38 = vadd.f32 %v824_v5, %v823_v37  ;;  %v3909_v20 = vunpack.c.l.bf16 %v2728_v28  ;;  %v3910_v58 = vunpack.c.h.bf16 %v2728_v28  ;;  %v3911_v59 = vunpack.c.l.bf16 %v2736_v29 }
 0x148   :  { %v3912_v9 = vunpack.c.h.bf16 %v2736_v29  ;;  %v3913_v15 = vunpack.c.l.bf16 %v2744_v34  ;;  %v3914_v47 = vunpack.c.h.bf16 %v2744_v34  ;;  %v3915_v13 = vunpack.c.l.bf16 %v2752_v1 }
 0x149   :  { %v826_v12 = vadd.f32 %v3910_v58, %v3909_v20  ;;  %v3916_v44 = vunpack.c.h.bf16 %v2752_v1  ;;  %v3917_v51 = vunpack.c.l.bf16 %v2760_v36  ;;  %v3918_v28 = vunpack.c.h.bf16 %v2760_v36 }
 0x14a   :  { %v835_v0 = vadd.f32 %v3912_v9, %v3911_v59  ;;  %v844_v21 = vadd.f32 %v3914_v47, %v3913_v15  ;;  %v3919_v6 = vunpack.c.l.bf16 %v2768_v42  ;;  %v3920_v29 = vunpack.c.h.bf16 %v2768_v42 }
 0x14b   :  { %v853_v22 = vadd.f32 %v3916_v44, %v3915_v13  ;;  %v862_v35 = vadd.f32 %v3918_v28, %v3917_v51  ;;  %v3921_v30 = vunpack.c.l.bf16 %v2776_v45  ;;  %v3922_v34 = vunpack.c.h.bf16 %v2776_v45 }
 0x14c   :  { %v871_v18 = vadd.f32 %v3920_v29, %v3919_v6  ;;  %v3923_v7 = vunpack.c.l.bf16 %v2784_v55  ;;  %v3924_v1 = vunpack.c.h.bf16 %v2784_v55  ;;  %v3925_v39 = vunpack.c.l.bf16 %v2732_v23 }
 0x14d   :  { %v880_v33 = vadd.f32 %v3922_v34, %v3921_v30  ;;  %v3926_v36 = vunpack.c.l.bf16 %v2740_v24  ;;  %v3927_v4 = vunpack.c.l.bf16 %v2748_v25  ;;  %v3928_v53 = vunpack.c.l.bf16 %v2756_v26 }
 0x14e   :  { %v889_v37 = vadd.f32 %v3924_v1, %v3923_v7  ;;  %v827_v40 = vadd.f32 %v826_v12, %v3925_v39  ;;  %v3929_v45 = vunpack.c.l.bf16 %v2764_v41  ;;  %v3930_v5 = vunpack.c.l.bf16 %v2772_v43 }
 0x14f   :  { %v836_v27 = vadd.f32 %v835_v0, %v3926_v36  ;;  %v845_v42 = vadd.f32 %v844_v21, %v3927_v4  ;;  %v854_v2 = vadd.f32 %v853_v22, %v3928_v53  ;;  %v3931_v55 = vunpack.c.l.bf16 %v2780_v49 }
 0x150   :  { %v863_v61 = vadd.f32 %v862_v35, %v3929_v45  ;;  %v872_v20 = vadd.f32 %v871_v18, %v3930_v5  ;;  %v3932_v12 = vunpack.c.l.bf16 %v2788_v57  ;;  %v3933_v9 = vunpack.c.h.bf16 %v2732_v23 }
 0x151   :  { %v881_v58 = vadd.f32 %v880_v33, %v3931_v55  ;;  %v3934_v15 = vunpack.c.h.bf16 %v2740_v24  ;;  %v3935_v21 = vunpack.c.h.bf16 %v2748_v25  ;;  %v3936_v44 = vunpack.c.h.bf16 %v2756_v26 }
 0x152   :  { %v890_v59 = vadd.f32 %v889_v37, %v3932_v12  ;;  %v828_v0 = vadd.f32 %v827_v40, %v3933_v9  ;;  %v3937_v51 = vunpack.c.h.bf16 %v2764_v41  ;;  %v3938_v35 = vunpack.c.h.bf16 %v2772_v43 }
 0x153   :  { %v837_v47 = vadd.f32 %v836_v27, %v3934_v15  ;;  %v846_v13 = vadd.f32 %v845_v42, %v3935_v21  ;;  %v855_v22 = vadd.f32 %v854_v2, %v3936_v44  ;;  %v3939_v29 = vunpack.c.h.bf16 %v2780_v49 }
 0x154   :  { %v864_v28 = vadd.f32 %v863_v61, %v3937_v51  ;;  %v873_v6 = vadd.f32 %v872_v20, %v3938_v35  ;;  %v3940_v23 = vunpack.c.h.bf16 %v2788_v57  ;;  %v829_v24 = vrot.slane %v828_v0, 4 }
 0x155   :  { %v882_v18 = vadd.f32 %v881_v58, %v3939_v29  ;;  %v838_v34 = vrot.slane %v837_v47, 4  ;;  %v847_v33 = vrot.slane %v846_v13, 4  ;;  %v856_v25 = vrot.slane %v855_v22, 4 }
 0x156   :  { %v891_v30 = vadd.f32 %v890_v59, %v3940_v23  ;;  %v865_v7 = vrot.slane %v864_v28, 4  ;;  %v874_v1 = vrot.slane %v873_v6, 4  ;;  %v830_v39 = vadd.f32 %v829_v24, %v828_v0 }
 0x157   :  { %v883_v26 = vrot.slane %v882_v18, 4  ;;  %v839_v41 = vadd.f32 %v838_v34, %v837_v47  ;;  %v848_v40 = vadd.f32 %v847_v33, %v846_v13  ;;  %v857_v36 = vadd.f32 %v856_v25, %v855_v22 }
 0x158   :  { %v892_v37 = vrot.slane %v891_v30, 4  ;;  %v866_v43 = vadd.f32 %v865_v7, %v864_v28  ;;  %v875_v27 = vadd.f32 %v874_v1, %v873_v6  ;;  %v831_v42 = vrot.slane %v830_v39, 2 }
 0x159   :  { %v884_v4 = vadd.f32 %v883_v26, %v882_v18  ;;  %v840_v53 = vrot.slane %v839_v41, 2  ;;  %v849_v57 = vrot.slane %v848_v40, 2  ;;  %v858_v2 = vrot.slane %v857_v36, 2 }
 0x15a   :  { %v893_v49 = vadd.f32 %v892_v37, %v891_v30  ;;  %v867_v45 = vrot.slane %v866_v43, 2  ;;  %v876_v61 = vrot.slane %v875_v27, 2  ;;  %v832_v55 = vadd.f32 %v831_v42, %v830_v39 }
 0x15b   :  { %v885_v5 = vrot.slane %v884_v4, 2  ;;  %v841_v58 = vadd.f32 %v840_v53, %v839_v41  ;;  %v850_v12 = vadd.f32 %v849_v57, %v848_v40  ;;  %v859_v59 = vadd.f32 %v858_v2, %v857_v36  ;;  %v3951_v57 = vld [vmem:[#allocation30_spill] sm:$0xff] }
 0x15c   :  { %v894_v20 = vrot.slane %v893_v49, 2  ;;  %v868_v9 = vadd.f32 %v867_v45, %v866_v43  ;;  %v877_v0 = vadd.f32 %v876_v61, %v875_v27  ;;  %v833_v21 = vrot.slane %v832_v55, 1 }
 0x15d   :  { %v886_v15 = vadd.f32 %v885_v5, %v884_v4  ;;  %v842_v13 = vrot.slane %v841_v58, 1  ;;  %v851_v44 = vrot.slane %v850_v12, 1  ;;  %v860_v22 = vrot.slane %v859_v59, 1 }
 0x15e   :  { %v895_v47 = vadd.f32 %v894_v20, %v893_v49  ;;  %v869_v51 = vrot.slane %v868_v9, 1  ;;  %v878_v28 = vrot.slane %v877_v0, 1  ;;  %v3190_v29 = vadd.f32 %v833_v21, %v832_v55 }
 0x15f   :  { %v887_v35 = vrot.slane %v886_v15, 1  ;;  %v3192_v18 = vadd.f32 %v842_v13, %v841_v58  ;;  %v3194_v23 = vadd.f32 %v851_v44, %v850_v12  ;;  %v3196_v30 = vadd.f32 %v860_v22, %v859_v59  ;;  %v3958_v58 = vld [vmem:[#allocation24_spill] sm:$0xff]  ;;  %v3964_v13 = vld [vmem:[#allocation27_spill] sm:$0xff] }
 0x160   :  { %v896_v6 = vrot.slane %v895_v47, 1  ;;  %v3198_v24 = vadd.f32 %v869_v51, %v868_v9  ;;  %v3200_v34 = vadd.f32 %v878_v28, %v877_v0  ;;  %v3941_v7 = vunpack.c.l.bf16 %v2792_v63  ;;  %v3966_v51 = vld [vmem:[#allocation29_spill] sm:$0xff] }
 0x161   :  { %v3202_v33 = vadd.f32 %v887_v35, %v886_v15  ;;  %v3942_v1 = vunpack.c.h.bf16 %v2792_v63  ;;  %v3943_v37 = vunpack.c.l.bf16 %v2800_v50  ;;  %v3944_v39 = vunpack.c.h.bf16 %v2800_v50  ;;  %v3962_v15 = vld [vmem:[#allocation26_spill] sm:$0xff]  ;;  %v3968_v35 = vld [vmem:[#allocation31_spill] sm:$0xff] }
 0x162   :  { %v3204_v25 = vadd.f32 %v896_v6, %v895_v47  ;;  %v3945_v40 = vunpack.c.l.bf16 %v2808_v62  ;;  %v3946_v36 = vunpack.c.h.bf16 %v2808_v62  ;;  %v3947_v27 = vunpack.c.l.bf16 %v2816_v10 }
 0x163   :  { %v898_v26 = vadd.f32 %v3942_v1, %v3941_v7  ;;  %v907_v41 = vadd.f32 %v3944_v39, %v3943_v37  ;;  %v3948_v4 = vunpack.c.h.bf16 %v2816_v10  ;;  %v3949_v42 = vunpack.c.l.bf16 %v3865_v8  ;;  %v3971_v37 = vld [vmem:[#allocation34_spill] sm:$0xff] }
 0x164   :  { %v916_v43 = vadd.f32 %v3946_v36, %v3945_v40  ;;  %v3950_v63 = vunpack.c.h.bf16 %v3865_v8  ;;  %v3952_v2 = vunpack.c.l.bf16 %v3951_v57  ;;  %v3953_v50 = vunpack.c.h.bf16 %v3951_v57  ;;  %v3960_v8 = vld [vmem:[#allocation25_spill] sm:$0xff] }
 0x165   :  { %v925_v49 = vadd.f32 %v3948_v4, %v3947_v27  ;;  %v3954_v61 = vunpack.c.l.bf16 %v3869_v48  ;;  %v3955_v62 = vunpack.c.h.bf16 %v3869_v48  ;;  %v3956_v20 = vunpack.c.l.bf16 %v3870_v32 }
 0x166   :  { %v934_v53 = vadd.f32 %v3950_v63, %v3949_v42  ;;  %v943_v45 = vadd.f32 %v3953_v50, %v3952_v2  ;;  %v3957_v10 = vunpack.c.h.bf16 %v3870_v32  ;;  %v3959_v12 = vunpack.c.l.bf16 %v3958_v58 }
 0x167   :  { %v952_v5 = vadd.f32 %v3955_v62, %v3954_v61  ;;  %v3961_v9 = vunpack.c.l.bf16 %v3960_v8  ;;  %v3963_v47 = vunpack.c.l.bf16 %v3962_v15  ;;  %v3965_v44 = vunpack.c.l.bf16 %v3964_v13 }
 0x168   :  { %v961_v55 = vadd.f32 %v3957_v10, %v3956_v20  ;;  %v899_v59 = vadd.f32 %v898_v26, %v3959_v12  ;;  %v3967_v48 = vunpack.c.l.bf16 %v3966_v51  ;;  %v3969_v6 = vunpack.c.l.bf16 %v3968_v35 }
 0x169   :  { %v908_v0 = vadd.f32 %v907_v41, %v3961_v9  ;;  %v917_v21 = vadd.f32 %v916_v43, %v3963_v47  ;;  %v926_v22 = vadd.f32 %v925_v49, %v3965_v44  ;;  %v3970_v32 = vunpack.c.l.bf16 %v2844_v19 }
 0x16a   :  { %v935_v28 = vadd.f32 %v934_v53, %v3967_v48  ;;  %v944_v7 = vadd.f32 %v943_v45, %v3969_v6  ;;  %v3972_v26 = vunpack.c.l.bf16 %v3971_v37  ;;  %v3973_v41 = vunpack.c.h.bf16 %v3958_v58 }
 0x16b   :  { %v953_v1 = vadd.f32 %v952_v5, %v3970_v32  ;;  %v3974_v36 = vunpack.c.h.bf16 %v3960_v8  ;;  %v3975_v27 = vunpack.c.h.bf16 %v3962_v15  ;;  %v3976_v49 = vunpack.c.h.bf16 %v3964_v13 }
 0x16c   :  { %v962_v39 = vadd.f32 %v961_v55, %v3972_v26  ;;  %v900_v40 = vadd.f32 %v899_v59, %v3973_v41  ;;  %v3977_v63 = vunpack.c.h.bf16 %v3966_v51  ;;  %v3978_v57 = vunpack.c.h.bf16 %v3968_v35 }
 0x16d   :  { %v909_v43 = vadd.f32 %v908_v0, %v3974_v36  ;;  %v918_v4 = vadd.f32 %v917_v21, %v3975_v27  ;;  %v927_v42 = vadd.f32 %v926_v22, %v3976_v49  ;;  %v3979_v50 = vunpack.c.h.bf16 %v2844_v19 }
 0x16e   :  { %v936_v53 = vadd.f32 %v935_v28, %v3977_v63  ;;  %v945_v2 = vadd.f32 %v944_v7, %v3978_v57  ;;  %v3980_v61 = vunpack.c.h.bf16 %v3971_v37  ;;  %v901_v5 = vrot.slane %v900_v40, 4 }
 0x16f   :  { %v954_v45 = vadd.f32 %v953_v1, %v3979_v50  ;;  %v910_v20 = vrot.slane %v909_v43, 4  ;;  %v919_v10 = vrot.slane %v918_v4, 4  ;;  %v928_v55 = vrot.slane %v927_v42, 4 }
 0x170   :  { %v963_v62 = vadd.f32 %v962_v39, %v3980_v61  ;;  %v937_v58 = vrot.slane %v936_v53, 4  ;;  %v946_v12 = vrot.slane %v945_v2, 4  ;;  %v902_v9 = vadd.f32 %v901_v5, %v900_v40 }
 0x171   :  { %v955_v59 = vrot.slane %v954_v45, 4  ;;  %v911_v0 = vadd.f32 %v910_v20, %v909_v43  ;;  %v920_v15 = vadd.f32 %v919_v10, %v918_v4  ;;  %v929_v47 = vadd.f32 %v928_v55, %v927_v42 }
 0x172   :  { %v964_v8 = vrot.slane %v963_v62, 4  ;;  %v938_v21 = vadd.f32 %v937_v58, %v936_v53  ;;  %v947_v13 = vadd.f32 %v946_v12, %v945_v2  ;;  %v903_v22 = vrot.slane %v902_v9, 2  ;;  %v3981_v58 = vld [vmem:[#allocation35_spill] sm:$0xff] }
 0x173   :  { %v956_v44 = vadd.f32 %v955_v59, %v954_v45  ;;  %v912_v51 = vrot.slane %v911_v0, 2  ;;  %v921_v48 = vrot.slane %v920_v15, 2  ;;  %v930_v28 = vrot.slane %v929_v47, 2 }
 0x174   :  { %v965_v19 = vadd.f32 %v964_v8, %v963_v62  ;;  %v939_v35 = vrot.slane %v938_v21, 2  ;;  %v948_v6 = vrot.slane %v947_v13, 2  ;;  %v904_v1 = vadd.f32 %v903_v22, %v902_v9 }
 0x175   :  { %v957_v7 = vrot.slane %v956_v44, 2  ;;  %v913_v37 = vadd.f32 %v912_v51, %v911_v0  ;;  %v922_v26 = vadd.f32 %v921_v48, %v920_v15  ;;  %v931_v39 = vadd.f32 %v930_v28, %v929_v47 }
 0x176   :  { %v966_v32 = vrot.slane %v965_v19, 2  ;;  %v940_v41 = vadd.f32 %v939_v35, %v938_v21  ;;  %v949_v40 = vadd.f32 %v948_v6, %v947_v13  ;;  %v905_v27 = vrot.slane %v904_v1, 1  ;;  %v3992_v35 = vld [vmem:[#allocation42_spill] sm:$0xff] }
 0x177   :  { %v958_v36 = vadd.f32 %v957_v7, %v956_v44  ;;  %v914_v4 = vrot.slane %v913_v37, 1  ;;  %v923_v49 = vrot.slane %v922_v26, 1  ;;  %v932_v42 = vrot.slane %v931_v39, 1 }
 0x178   :  { %v967_v43 = vadd.f32 %v966_v32, %v965_v19  ;;  %v941_v63 = vrot.slane %v940_v41, 1  ;;  %v950_v53 = vrot.slane %v949_v40, 1  ;;  %v3270_v50 = vadd.f32 %v905_v27, %v904_v1  ;;  %v3995_v32 = vld [vmem:[#allocation44_spill] sm:$0xff] }
 0x179   :  { %v959_v57 = vrot.slane %v958_v36, 1  ;;  %v3272_v45 = vadd.f32 %v914_v4, %v913_v37  ;;  %v3274_v61 = vadd.f32 %v923_v49, %v922_v26  ;;  %v3276_v62 = vadd.f32 %v932_v42, %v931_v39  ;;  %v3998_v26 = vld [vmem:[#allocation46_spill] sm:$0xff] }
 0x17a   :  { %v968_v2 = vrot.slane %v967_v43, 1  ;;  %v3278_v5 = vadd.f32 %v941_v63, %v940_v41  ;;  %v3280_v20 = vadd.f32 %v950_v53, %v949_v40  ;;  %v3982_v12 = vunpack.c.l.bf16 %v3981_v58  ;;  %v4001_v40 = vld [vmem:[#allocation36_spill] sm:$0xff]  ;;  %v4005_v49 = vld [vmem:[#allocation38_spill] sm:$0xff] }
 0x17b   :  { %v3282_v10 = vadd.f32 %v959_v57, %v958_v36  ;;  %v3983_v59 = vunpack.c.h.bf16 %v3981_v58  ;;  %v3984_v9 = vunpack.c.l.bf16 %v2864_v11  ;;  %v3985_v0 = vunpack.c.h.bf16 %v2864_v11  ;;  %v4007_v53 = vld [vmem:[#allocation40_spill] sm:$0xff]  ;;  %v4009_v58 = vld [vmem:[#allocation41_spill] sm:$0xff] }
 0x17c   :  { %v3284_v55 = vadd.f32 %v968_v2, %v967_v43  ;;  %v3986_v47 = vunpack.c.l.bf16 %v2872_v17  ;;  %v3987_v21 = vunpack.c.h.bf16 %v2872_v17  ;;  %v3988_v44 = vunpack.c.l.bf16 %v3875_v56 }
 0x17d   :  { %v970_v8 = vadd.f32 %v3983_v59, %v3982_v12  ;;  %v979_v15 = vadd.f32 %v3985_v0, %v3984_v9  ;;  %v3989_v19 = vunpack.c.h.bf16 %v3875_v56  ;;  %v3990_v51 = vunpack.c.l.bf16 %v2888_v14  ;;  %v4011_v9 = vld [vmem:[#allocation43_spill] sm:$0xff] }
 0x17e   :  { %v988_v13 = vadd.f32 %v3987_v21, %v3986_v47  ;;  %v3991_v48 = vunpack.c.h.bf16 %v2888_v14  ;;  %v3993_v6 = vunpack.c.l.bf16 %v3992_v35  ;;  %v3994_v11 = vunpack.c.h.bf16 %v3992_v35  ;;  %v4003_v14 = vld [vmem:[#allocation37_spill] sm:$0xff] }
 0x17f   :  { %v997_v22 = vadd.f32 %v3989_v19, %v3988_v44  ;;  %v3996_v1 = vunpack.c.l.bf16 %v3995_v32  ;;  %v3997_v17 = vunpack.c.h.bf16 %v3995_v32  ;;  %v3999_v39 = vunpack.c.l.bf16 %v3998_v26  ;;  %v4013_v21 = vld [vmem:[#allocation45_spill] sm:$0xff] }
 0x180   :  { %v1006_v28 = vadd.f32 %v3991_v48, %v3990_v51  ;;  %v1015_v7 = vadd.f32 %v3994_v11, %v3993_v6  ;;  %v4000_v56 = vunpack.c.h.bf16 %v3998_v26  ;;  %v4002_v36 = vunpack.c.l.bf16 %v4001_v40  ;;  %v4015_v51 = vld [vmem:[#allocation47_spill] sm:$0xff] }
 0x181   :  { %v1024_v37 = vadd.f32 %v3997_v17, %v3996_v1  ;;  %v4004_v27 = vunpack.c.l.bf16 %v4003_v14  ;;  %v4006_v42 = vunpack.c.l.bf16 %v4005_v49  ;;  %v4008_v57 = vunpack.c.l.bf16 %v4007_v53 }
 0x182   :  { %v1033_v41 = vadd.f32 %v4000_v56, %v3999_v39  ;;  %v971_v43 = vadd.f32 %v970_v8, %v4002_v36  ;;  %v4010_v12 = vunpack.c.l.bf16 %v4009_v58  ;;  %v4012_v0 = vunpack.c.l.bf16 %v4011_v9 }
 0x183   :  { %v980_v4 = vadd.f32 %v979_v15, %v4004_v27  ;;  %v989_v63 = vadd.f32 %v988_v13, %v4006_v42  ;;  %v998_v2 = vadd.f32 %v997_v22, %v4008_v57  ;;  %v4014_v44 = vunpack.c.l.bf16 %v4013_v21 }
 0x184   :  { %v1007_v59 = vadd.f32 %v1006_v28, %v4010_v12  ;;  %v1016_v47 = vadd.f32 %v1015_v7, %v4012_v0  ;;  %v4016_v8 = vunpack.c.l.bf16 %v4015_v51  ;;  %v4017_v15 = vunpack.c.h.bf16 %v4001_v40 }
 0x185   :  { %v1025_v19 = vadd.f32 %v1024_v37, %v4014_v44  ;;  %v4018_v13 = vunpack.c.h.bf16 %v4003_v14  ;;  %v4019_v22 = vunpack.c.h.bf16 %v4005_v49  ;;  %v4020_v28 = vunpack.c.h.bf16 %v4007_v53 }
 0x186   :  { %v1034_v48 = vadd.f32 %v1033_v41, %v4016_v8  ;;  %v972_v35 = vadd.f32 %v971_v43, %v4017_v15  ;;  %v4021_v7 = vunpack.c.h.bf16 %v4009_v58  ;;  %v4022_v17 = vunpack.c.h.bf16 %v4011_v9 }
 0x187   :  { %v981_v6 = vadd.f32 %v980_v4, %v4018_v13  ;;  %v990_v11 = vadd.f32 %v989_v63, %v4019_v22  ;;  %v999_v32 = vadd.f32 %v998_v2, %v4020_v28  ;;  %v4023_v26 = vunpack.c.h.bf16 %v4013_v21 }
 0x188   :  { %v1008_v1 = vadd.f32 %v1007_v59, %v4021_v7  ;;  %v1017_v37 = vadd.f32 %v1016_v47, %v4022_v17  ;;  %v4024_v56 = vunpack.c.h.bf16 %v4015_v51  ;;  %v973_v40 = vrot.slane %v972_v35, 4 }
 0x189   :  { %v1026_v39 = vadd.f32 %v1025_v19, %v4023_v26  ;;  %v982_v36 = vrot.slane %v981_v6, 4  ;;  %v991_v43 = vrot.slane %v990_v11, 4  ;;  %v1000_v14 = vrot.slane %v999_v32, 4 }
 0x18a   :  { %v1035_v41 = vadd.f32 %v1034_v48, %v4024_v56  ;;  %v1009_v27 = vrot.slane %v1008_v1, 4  ;;  %v1018_v4 = vrot.slane %v1017_v37, 4  ;;  %v974_v63 = vadd.f32 %v973_v40, %v972_v35 }
 0x18b   :  { %v1027_v49 = vrot.slane %v1026_v39, 4  ;;  %v983_v53 = vadd.f32 %v982_v36, %v981_v6  ;;  %v992_v57 = vadd.f32 %v991_v43, %v990_v11  ;;  %v1001_v2 = vadd.f32 %v1000_v14, %v999_v32 }
 0x18c   :  { %v1036_v42 = vrot.slane %v1035_v41, 4  ;;  %v1010_v58 = vadd.f32 %v1009_v27, %v1008_v1  ;;  %v1019_v12 = vadd.f32 %v1018_v4, %v1017_v37  ;;  %v975_v0 = vrot.slane %v974_v63, 2 }
 0x18d   :  { %v1028_v59 = vadd.f32 %v1027_v49, %v1026_v39  ;;  %v984_v47 = vrot.slane %v983_v53, 2  ;;  %v993_v21 = vrot.slane %v992_v57, 2  ;;  %v1002_v44 = vrot.slane %v1001_v2, 2 }
 0x18e   :  { %v1037_v9 = vadd.f32 %v1036_v42, %v1035_v41  ;;  %v1011_v19 = vrot.slane %v1010_v58, 2  ;;  %v1020_v51 = vrot.slane %v1019_v12, 2  ;;  %v976_v15 = vadd.f32 %v975_v0, %v974_v63 }
 0x18f   :  { %v1029_v8 = vrot.slane %v1028_v59, 2  ;;  %v985_v13 = vadd.f32 %v984_v47, %v983_v53  ;;  %v994_v22 = vadd.f32 %v993_v21, %v992_v57  ;;  %v1003_v28 = vadd.f32 %v1002_v44, %v1001_v2 }
 0x190   :  { %v1038_v48 = vrot.slane %v1037_v9, 2  ;;  %v1012_v35 = vadd.f32 %v1011_v19, %v1010_v58  ;;  %v1021_v6 = vadd.f32 %v1020_v51, %v1019_v12  ;;  %v977_v7 = vrot.slane %v976_v15, 1 }
 0x191   :  { %v1030_v11 = vadd.f32 %v1029_v8, %v1028_v59  ;;  %v986_v1 = vrot.slane %v985_v13, 1  ;;  %v995_v17 = vrot.slane %v994_v22, 1  ;;  %v1004_v37 = vrot.slane %v1003_v28, 1 }
 0x192   :  { %v1039_v32 = vadd.f32 %v1038_v48, %v1037_v9  ;;  %v1013_v26 = vrot.slane %v1012_v35, 1  ;;  %v1022_v39 = vrot.slane %v1021_v6, 1  ;;  %v3350_v40 = vadd.f32 %v977_v7, %v976_v15 }
 0x193   :  { %v1031_v56 = vrot.slane %v1030_v11, 1  ;;  %v3352_v36 = vadd.f32 %v986_v1, %v985_v13  ;;  %v3354_v43 = vadd.f32 %v995_v17, %v994_v22  ;;  %v3356_v14 = vadd.f32 %v1004_v37, %v1003_v28 }
 0x194   :  { %v1040_v41 = vrot.slane %v1039_v32, 1  ;;  %v3358_v27 = vadd.f32 %v1013_v26, %v1012_v35  ;;  %v3360_v4 = vadd.f32 %v1022_v39, %v1021_v6  ;;  %v1074_v63 = vpack.c.bf16 %v3110_v31, %v3110_v31 }
 0x195   :  { %v3362_v49 = vadd.f32 %v1031_v56, %v1030_v11  ;;  %v1075_v53 = vpack.c.bf16 %v3112_v52, %v3112_v52  ;;  %v1076_v57 = vpack.c.bf16 %v3114_v60, %v3114_v60  ;;  %v1077_v2 = vpack.c.bf16 %v3116_v16, %v3116_v16 }
 0x196   :  { %v3364_v42 = vadd.f32 %v1040_v41, %v1039_v32  ;;  %v1078_v58 = vpack.c.bf16 %v3118_v54, %v3118_v54  ;;  %v1079_v12 = vpack.c.bf16 %v3120_v3, %v3120_v3  ;;  %v1080_v59 = vpack.c.bf16 %v3122_v46, %v3122_v46 }
 0x197   :  { %v1081_v31 = vpack.c.bf16 %v3124_v38, %v3124_v38  ;;  %v1082_v52 = vpack.c.bf16 %v3190_v29, %v3190_v29  ;;  %v1083_v60 = vpack.c.bf16 %v3192_v18, %v3192_v18  ;;  %v1084_v16 = vpack.c.bf16 %v3194_v23, %v3194_v23 }
 0x198   :  { %v1085_v54 = vpack.c.bf16 %v3196_v30, %v3196_v30  ;;  %v1086_v3 = vpack.c.bf16 %v3198_v24, %v3198_v24  ;;  %v1087_v46 = vpack.c.bf16 %v3200_v34, %v3200_v34  ;;  %v1088_v38 = vpack.c.bf16 %v3202_v33, %v3202_v33 }
 0x199   :  { %v1089_v29 = vpack.c.bf16 %v3204_v25, %v3204_v25  ;;  %v1090_v18 = vpack.c.bf16 %v3270_v50, %v3270_v50  ;;  %v1091_v23 = vpack.c.bf16 %v3272_v45, %v3272_v45  ;;  %v1092_v30 = vpack.c.bf16 %v3274_v61, %v3274_v61 }
 0x19a   :  { %v1093_v24 = vpack.c.bf16 %v3276_v62, %v3276_v62  ;;  %v1094_v34 = vpack.c.bf16 %v3278_v5, %v3278_v5  ;;  %v1095_v33 = vpack.c.bf16 %v3280_v20, %v3280_v20  ;;  %v1096_v25 = vpack.c.bf16 %v3282_v10, %v3282_v10 }
 0x19b   :  { %v1097_v50 = vpack.c.bf16 %v3284_v55, %v3284_v55  ;;  %v1098_v45 = vpack.c.bf16 %v3350_v40, %v3350_v40  ;;  %v1099_v61 = vpack.c.bf16 %v3352_v36, %v3352_v36  ;;  %v1100_v62 = vpack.c.bf16 %v3354_v43, %v3354_v43 }
 0x19c   :  { %v1101_v5 = vpack.c.bf16 %v3356_v14, %v3356_v14  ;;  %v1102_v20 = vpack.c.bf16 %v3358_v27, %v3358_v27  ;;  %v1103_v10 = vpack.c.bf16 %v3360_v4, %v3360_v4  ;;  %v1104_v55 = vpack.c.bf16 %v3362_v49, %v3362_v49 }
 0x19d   :  { %v1105_v9 = vpack.c.bf16 %v3364_v42, %v3364_v42  ;;  %v1138_v0 = vunpack.c.l.b16 %v1074_v63  ;;  %v1139_v47 = vunpack.c.l.b16 %v1075_v53  ;;  %v1140_v21 = vunpack.c.l.b16 %v1076_v57 }
 0x19e   :  { %v1141_v44 = vunpack.c.l.b16 %v1077_v2  ;;  %v1142_v19 = vunpack.c.l.b16 %v1078_v58  ;;  %v1143_v51 = vunpack.c.l.b16 %v1079_v12  ;;  %v1144_v8 = vunpack.c.l.b16 %v1080_v59 }
 0x19f   :  { %v1145_v48 = vunpack.c.l.b16 %v1081_v31  ;;  %v1146_v15 = vunpack.c.l.b16 %v1082_v52  ;;  %v1147_v13 = vunpack.c.l.b16 %v1083_v60  ;;  %v1148_v22 = vunpack.c.l.b16 %v1084_v16 }
 0x1a0   :  { %v1149_v28 = vunpack.c.l.b16 %v1085_v54  ;;  %v1150_v35 = vunpack.c.l.b16 %v1086_v3  ;;  %v1151_v6 = vunpack.c.l.b16 %v1087_v46  ;;  %v1152_v11 = vunpack.c.l.b16 %v1088_v38 }
 0x1a1   :  { %v1153_v32 = vunpack.c.l.b16 %v1089_v29  ;;  %v1154_v7 = vunpack.c.l.b16 %v1090_v18  ;;  %v1155_v1 = vunpack.c.l.b16 %v1091_v23  ;;  %v1156_v17 = vunpack.c.l.b16 %v1092_v30 }
 0x1a2   :  { %v1157_v37 = vunpack.c.l.b16 %v1093_v24  ;;  %v1158_v26 = vunpack.c.l.b16 %v1094_v34  ;;  %v1159_v39 = vunpack.c.l.b16 %v1095_v33  ;;  %v1160_v56 = vunpack.c.l.b16 %v1096_v25 }
 0x1a3   :  { %v1161_v41 = vunpack.c.l.b16 %v1097_v50  ;;  %v1162_v40 = vunpack.c.l.b16 %v1098_v45  ;;  %v1163_v36 = vunpack.c.l.b16 %v1099_v61  ;;  %v1164_v43 = vunpack.c.l.b16 %v1100_v62 }
 0x1a4   :  { %v1165_v14 = vunpack.c.l.b16 %v1101_v5  ;;  %v1166_v27 = vunpack.c.l.b16 %v1102_v20  ;;  %v1167_v4 = vunpack.c.l.b16 %v1103_v10  ;;  %v1168_v49 = vunpack.c.l.b16 %v1104_v55 }
 0x1a5   :  { %v1169_v42 = vunpack.c.l.b16 %v1105_v9  ;;  %v1171_v63 = vsel %vm1170_vm8, %v1139_v47, %v1138_v0  ;;  %v1184_v57 = vsel %vm1170_vm8, %v1147_v13, %v1146_v15  ;;  %v1191_v2 = vsel %vm1170_vm8, %v1155_v1, %v1154_v7 }
 0x1a6   :  { %v1173_v53 = vsel %vm1172_vm9, %v1140_v21, %v1171_v63  ;;  %v1198_v58 = vsel %vm1170_vm8, %v1163_v36, %v1162_v40  ;;  %v1185_v59 = vsel %vm1172_vm9, %v1148_v22, %v1184_v57  ;;  %v1192_v31 = vsel %vm1172_vm9, %v1156_v17, %v1191_v2 }
 0x1a7   :  { %v1175_v12 = vsel %vm1174_vm10, %v1141_v44, %v1173_v53  ;;  %v1199_v52 = vsel %vm1172_vm9, %v1164_v43, %v1198_v58  ;;  %v1186_v16 = vsel %vm1174_vm10, %v1149_v28, %v1185_v59  ;;  %v1193_v54 = vsel %vm1174_vm10, %v1157_v37, %v1192_v31 }
 0x1a8   :  { %v1177_v60 = vsel %vm1176_vm11, %v1142_v19, %v1175_v12  ;;  %v1200_v3 = vsel %vm1174_vm10, %v1165_v14, %v1199_v52  ;;  %v1187_v38 = vsel %vm1176_vm11, %v1150_v35, %v1186_v16  ;;  %v1194_v29 = vsel %vm1176_vm11, %v1158_v26, %v1193_v54 }
 0x1a9   :  { %v1179_v46 = vsel %vm1178_vm12, %v1143_v51, %v1177_v60  ;;  %v1201_v18 = vsel %vm1176_vm11, %v1166_v27, %v1200_v3  ;;  %v1188_v30 = vsel %vm1178_vm12, %v1151_v6, %v1187_v38  ;;  %v1195_v24 = vsel %vm1178_vm12, %v1159_v39, %v1194_v29 }
 0x1aa   :  { %v1181_v23 = vsel %vm1180_vm13, %v1144_v8, %v1179_v46  ;;  %v1202_v34 = vsel %vm1178_vm12, %v1167_v4, %v1201_v18  ;;  %v1189_v25 = vsel %vm1180_vm13, %v1152_v11, %v1188_v30  ;;  %v1196_v50 = vsel %vm1180_vm13, %v1160_v56, %v1195_v24 }
 0x1ab   :  { %v1183_v33 = vsel %vm1182_vm14, %v1145_v48, %v1181_v23  ;;  %v1203_v45 = vsel %vm1180_vm13, %v1168_v49, %v1202_v34  ;;  %v1190_v61 = vsel %vm1182_vm14, %v1153_v32, %v1189_v25  ;;  %v1197_v62 = vsel %vm1182_vm14, %v1161_v41, %v1196_v50 }
 0x1ac   :  { %v1204_v5 = vsel %vm1182_vm14, %v1169_v42, %v1203_v45  ;;  %v1205_v20 = vpack.c.b16 %v1183_v33, %v1183_v33  ;;  %v1206_v10 = vpack.c.b16 %v1190_v61, %v1190_v61  ;;  %v1207_v55 = vpack.c.b16 %v1197_v62, %v1197_v62 }
 0x1ad   :  { %v1208_v9 = vpack.c.b16 %v1204_v5, %v1204_v5 }
 0x1ae   :  { %1213 = vst [vmem:[#allocation8] sm:$0xf] %v1205_v20 }
 0x1af   :  { %1214 = vst [vmem:[#allocation8 + $0x4] sm:$0xf] %v1206_v10 }
 0x1b0   :  { %1215 = vst [vmem:[#allocation8 + $0x8] sm:$0xf] %v1207_v55 }
 0x1b1   :  { %1216 = vst [vmem:[#allocation8 + $0xc] sm:$0xf] %v1208_v9 }
 0x1b2   :  { %1229 = dma.vmem_to_hbm [thread:$0]  %s1222_s2, 256, %s1224_s30, [#allocation4], %s1718_s22, %s1718_s22, %s1719_s23  }
 0x1b3   :  { %1714 = dma.done.wait [#allocation4], 256  }
 0x1b4   :  { %1715 = vsyncadd [#allocation4], 4294967040 }
 0x1b5   :  { %1234 = vsyncpa [#allocation3], 1 }
 0x1b6   :  { %1235 = vsyncpa [#allocation6], 1 }
 0x1b7   :  { %1236 = vsyncpa [#allocation4], 1 }

</bundles_post_ra>
